<compile_context>
chip_gen: v5e
topology: v5e:2x2
jax: 0.10.0
libtpu: 0.0.40
codegen_flags: <defaults>
</compile_context>

<pallas_src>
import functools

import jax
import jax.numpy as jnp
import numpy as np
from jax.experimental import pallas as pl
from jax.experimental.pallas import tpu as pltpu


# ---------------------------------------------------------------------------
# Pallas kernels
# ---------------------------------------------------------------------------

def _conv_bn_relu_pool_kernel(x_ref, wt_ref, shift_ref, se_ref, so_ref,
                              te_ref, to_ref, out_ref):
    """Fused Conv(5x5, s=1, p=0) + BN(eval) + ReLU + MaxPool(2x2). One image/step.

    x_ref     : (1, H, W*C)      NHWC image with W and C flattened together.
    wt_ref    : (K, W*C, OW*OC)  block-Toeplitz conv weights, BN scale folded in.
    shift_ref : (1, OW*OC)       BN/bias shift, tiled over OW.
    se/so_ref : (PH, OH)         0/1 row selectors (even / odd conv rows).
    te/to_ref : (OW*OC, PW*OC)   0/1 column-group selectors (even / odd cols).
    out_ref   : (1, PH, PW*OC)   pooled output, (h, w*c) layout.
    """
    K = wt_ref.shape[0]
    oh = x_ref.shape[1] - K + 1

    # Conv as K row-shifted dense matmuls (in-VMEM patch expansion, no im2col).
    acc = jnp.zeros((oh, wt_ref.shape[2]), jnp.float32)
    for di in range(K):                                    # static unroll, K == 5
        acc += jnp.dot(x_ref[0, di:di + oh, :], wt_ref[di],
                       preferred_element_type=jnp.float32)

    y = jnp.maximum(acc + shift_ref[...], 0.0)             # BN shift + ReLU

    # 2x2 / stride-2 max-pool: row pairs then column-group pairs via 0/1
    # selection matmuls + elementwise max (pure MXU/VPU, no strided slicing).
    rp = jnp.maximum(
        jnp.dot(se_ref[...], y, preferred_element_type=jnp.float32),
        jnp.dot(so_ref[...], y, preferred_element_type=jnp.float32))
    out_ref[0] = jnp.maximum(
        jnp.dot(rp, te_ref[...], preferred_element_type=jnp.float32),
        jnp.dot(rp, to_ref[...], preferred_element_type=jnp.float32))


def _fc_chain_kernel(x_ref, w1_ref, b1_ref, w3_ref, b3_ref, w4_ref, b4_ref,
                     out_ref):
    """Fused fc1 -> fc3 -> fc4 (no activations in between, matching the module).
    The final weight/bias are zero-padded to 128 output lanes."""
    h = jnp.dot(x_ref[...], w1_ref[...],
                preferred_element_type=jnp.float32) + b1_ref[...]
    h = jnp.dot(h, w3_ref[...],
                preferred_element_type=jnp.float32) + b3_ref[...]
    out_ref[...] = jnp.dot(h, w4_ref[...],
                           preferred_element_type=jnp.float32) + b4_ref[...]


_PARALLEL = pltpu.CompilerParams(dimension_semantics=("parallel",))


def _round_up(x, m):
    return (x + m - 1) // m * m


# ---------------------------------------------------------------------------
# Pallas call wrappers
# ---------------------------------------------------------------------------

def conv_bn_relu_pool(x, wt, shift, se, so, te, to):
    """x: [N, H, W*C] -> pooled [N, PH, PW*OC]."""
    N, H, WC = x.shape
    K, _, owoc = wt.shape
    ph, oh = se.shape
    pwoc = te.shape[1]
    return pl.pallas_call(
        _conv_bn_relu_pool_kernel,
        grid=(N,),
        in_specs=[
            pl.BlockSpec((1, H, WC), lambda n: (n, 0, 0)),
            pl.BlockSpec((K, WC, owoc), lambda n: (0, 0, 0)),
            pl.BlockSpec((1, owoc), lambda n: (0, 0)),
            pl.BlockSpec((ph, oh), lambda n: (0, 0)),
            pl.BlockSpec((ph, oh), lambda n: (0, 0)),
            pl.BlockSpec((owoc, pwoc), lambda n: (0, 0)),
            pl.BlockSpec((owoc, pwoc), lambda n: (0, 0)),
        ],
        out_specs=pl.BlockSpec((1, ph, pwoc), lambda n: (n, 0, 0)),
        out_shape=jax.ShapeDtypeStruct((N, ph, pwoc), jnp.float32),
        compiler_params=_PARALLEL,
    )(x, wt, shift, se, so, te, to)


def fc_chain(flat, w1, b1, w3, b3, w4p, b4p):
    """flat: [N, 400] -> padded logits [N, 128] (valid classes in columns 0..nc)."""
    N, F = flat.shape
    H1, H3, OP = w1.shape[1], w3.shape[1], w4p.shape[1]
    tm = 128 if N >= 128 else _round_up(N, 8)
    n_pad = _round_up(N, tm)
    if n_pad != N:
        flat = jnp.pad(flat, ((0, n_pad - N), (0, 0)))
    out = pl.pallas_call(
        _fc_chain_kernel,
        grid=(n_pad // tm,),
        in_specs=[
            pl.BlockSpec((tm, F), lambda i: (i, 0)),
            pl.BlockSpec((F, H1), lambda i: (0, 0)),
            pl.BlockSpec((1, H1), lambda i: (0, 0)),
            pl.BlockSpec((H1, H3), lambda i: (0, 0)),
            pl.BlockSpec((1, H3), lambda i: (0, 0)),
            pl.BlockSpec((H3, OP), lambda i: (0, 0)),
            pl.BlockSpec((1, OP), lambda i: (0, 0)),
        ],
        out_specs=pl.BlockSpec((tm, OP), lambda i: (i, 0)),
        out_shape=jax.ShapeDtypeStruct((n_pad, OP), jnp.float32),
        compiler_params=_PARALLEL,
    )(flat, w1, b1, w3, b3, w4p, b4p)
    return out[:N]


# ---------------------------------------------------------------------------
# One-time parameter preprocessing (BN fold, Toeplitz build, permutations)
# ---------------------------------------------------------------------------

def _build_conv_layer(w_oikk, conv_b, gamma, beta, mean, var, W, eps=1e-5):
    """Build block-Toeplitz conv weights (BN scale folded in), the shift row,
    and the max-pool selection matrices.  Assumes square H == W input,
    stride=1, padding=0 (matches the module)."""
    w = np.asarray(w_oikk, np.float32)                     # [OC, C, K, K]
    OC, C, K, _ = w.shape
    scale = np.asarray(gamma, np.float32) / np.sqrt(np.asarray(var, np.float32) + eps)
    shift = (np.asarray(conv_b, np.float32) - np.asarray(mean, np.float32)) * scale \
            + np.asarray(beta, np.float32)
    ws = w * scale[:, None, None, None]

    ow = W - K + 1
    ph = pw = ow // 2

    wt = np.zeros((K, W * C, ow * OC), np.float32)
    for di in range(K):
        for dj in range(K):
            blk = ws[:, :, di, dj].T                       # [C, OC]
            for j in range(ow):
                wt[di, (j + dj) * C:(j + dj + 1) * C, j * OC:(j + 1) * OC] = blk

    shift_row = np.tile(shift, ow).reshape(1, ow * OC)

    se = np.zeros((ph, ow), np.float32)
    so = np.zeros((ph, ow), np.float32)
    se[np.arange(ph), 2 * np.arange(ph)] = 1.0
    so[np.arange(ph), 2 * np.arange(ph) + 1] = 1.0

    eye = np.eye(OC, dtype=np.float32)
    te = np.zeros((ow * OC, pw * OC), np.float32)
    to = np.zeros((ow * OC, pw * OC), np.float32)
    for j in range(pw):
        te[(2 * j) * OC:(2 * j + 1) * OC, j * OC:(j + 1) * OC] = eye
        to[(2 * j + 1) * OC:(2 * j + 2) * OC, j * OC:(j + 1) * OC] = eye

    return tuple(jnp.asarray(a, jnp.float32)
                 for a in (wt, shift_row, se, so, te, to))


def prepare_kernel_params(p, num_classes=10, eps=1e-5):
    kp = {}
    (kp["c1_wt"], kp["c1_shift"], kp["c1_se"], kp["c1_so"],
     kp["c1_te"], kp["c1_to"]) = _build_conv_layer(
        p["conv1_w"], p["conv1_b"], p["bn1_gamma"], p["bn1_beta"],
        p["bn1_mean"], p["bn1_var"], W=32, eps=eps)
    (kp["c2_wt"], kp["c2_shift"], kp["c2_se"], kp["c2_so"],
     kp["c2_te"], kp["c2_to"]) = _build_conv_layer(
        p["conv2_w"], p["conv2_b"], p["bn2_gamma"], p["bn2_beta"],
        p["bn2_mean"], p["bn2_var"], W=14, eps=eps)

    # fc1: fold the (torch NCHW flatten) -> (our pooled [h, w*c] flatten)
    # permutation into the weight so activations never need a transpose.
    fc1_w = np.asarray(p["fc1_w"], np.float32)             # [120, 400], [out, in]
    t = np.arange(400)
    h, rem = t // 80, t % 80
    w_, c = rem // 16, rem % 16
    src = c * 25 + h * 5 + w_                               # torch index (c, h, w)
    kp["w1"] = jnp.asarray(fc1_w[:, src].T)                 # [400, 120]
    kp["b1"] = jnp.asarray(np.asarray(p["fc1_b"], np.float32).reshape(1, -1))
    kp["w3"] = jnp.asarray(np.asarray(p["fc3_w"], np.float32).T)   # [120, 84]
    kp["b3"] = jnp.asarray(np.asarray(p["fc3_b"], np.float32).reshape(1, -1))

    # fc4: pad output channels to 128 lanes (sliced back in the wrapper).
    fc4_w = np.asarray(p["fc4_w"], np.float32)              # [nc, 84]
    fc4_b = np.asarray(p["fc4_b"], np.float32)
    w4p = np.zeros((84, 128), np.float32)
    w4p[:, :num_classes] = fc4_w.T
    b4p = np.zeros((1, 128), np.float32)
    b4p[0, :num_classes] = fc4_b
    kp["w4p"] = jnp.asarray(w4p)
    kp["b4p"] = jnp.asarray(b4p)
    return kp


# ---------------------------------------------------------------------------
# Parameter construction (deterministic, mirrors init_params())
# ---------------------------------------------------------------------------

def make_params(key, num_classes=10):
    ks = jax.random.split(key, 8)

    def kaiming_fan_out(k, shape):           # Conv2d: kaiming_normal_(mode='fan_out')
        oc, _, kh, kw = shape
        std = (2.0 / (oc * kh * kw)) ** 0.5
        return std * jax.random.normal(k, shape, jnp.float32)

    def linear_w(k, shape):                  # Linear: normal_(std=0.001)
        return 0.001 * jax.random.normal(k, shape, jnp.float32)

    p = {}
    p["conv1_w"] = kaiming_fan_out(ks[0], (6, 3, 5, 5))
    p["conv1_b"] = jnp.zeros((6,), jnp.float32)
    p["bn1_gamma"] = jnp.ones((6,), jnp.float32)
    p["bn1_beta"] = jnp.zeros((6,), jnp.float32)
    p["bn1_mean"] = jnp.zeros((6,), jnp.float32)
    p["bn1_var"] = jnp.ones((6,), jnp.float32)

    p["conv2_w"] = kaiming_fan_out(ks[1], (16, 6, 5, 5))
    p["conv2_b"] = jnp.zeros((16,), jnp.float32)
    p["bn2_gamma"] = jnp.ones((16,), jnp.float32)
    p["bn2_beta"] = jnp.zeros((16,), jnp.float32)
    p["bn2_mean"] = jnp.zeros((16,), jnp.float32)
    p["bn2_var"] = jnp.ones((16,), jnp.float32)

    p["fc1_w"] = linear_w(ks[2], (120, 400))   # PyTorch Linear weight [out, in]
    p["fc1_b"] = jnp.zeros((120,), jnp.float32)
    p["fc3_w"] = linear_w(ks[3], (84, 120))
    p["fc3_b"] = jnp.zeros((84,), jnp.float32)
    p["fc4_w"] = linear_w(ks[4], (num_classes, 84))
    p["fc4_b"] = jnp.zeros((num_classes,), jnp.float32)
    return p


# ---------------------------------------------------------------------------
# Forward pass (matches Lenet.forward; fc1/fc3/fc4 have no activations between,
# exactly as in the reference module)
# ---------------------------------------------------------------------------

@functools.partial(jax.jit, static_argnames=("num_classes",))
def lenet_forward(x_nchw, kp, num_classes=10):
    N = x_nchw.shape[0]
    # NCHW (PyTorch) -> NHWC -> [N, H, W*C] (layout plumbing only).
    x = jnp.transpose(x_nchw, (0, 2, 3, 1)).astype(jnp.float32)
    x = x.reshape(N, x.shape[1], -1)                                 # [N, 32, 96]

    x = conv_bn_relu_pool(x, kp["c1_wt"], kp["c1_shift"], kp["c1_se"],
                          kp["c1_so"], kp["c1_te"], kp["c1_to"])     # [N, 14, 84]
    x = conv_bn_relu_pool(x, kp["c2_wt"], kp["c2_shift"], kp["c2_se"],
                          kp["c2_so"], kp["c2_te"], kp["c2_to"])     # [N, 5, 80]

    flat = x.reshape(N, -1)                                          # [N, 400]
    logits = fc_chain(flat, kp["w1"], kp["b1"], kp["w3"], kp["b3"],
                      kp["w4p"], kp["b4p"])                          # [N, 128]
    return logits[:, :num_classes]


if __name__ == "__main__":
    key = jax.random.PRNGKey(0)
    kx, kparam = jax.random.split(key)
    # fc1 expects 5*5*16 features => spatial input must be 3x32x32; batch=2.
    x = jax.random.normal(kx, (2, 3, 32, 32), jnp.float32)
    raw_params = make_params(kparam, num_classes=10)
    kernel_params = prepare_kernel_params(raw_params, num_classes=10)

    out = lenet_forward(x, kernel_params, num_classes=10)
    jax.block_until_ready(out)
    assert out.shape == (2, 10), out.shape
    print("KERNEL_OK")
</pallas_src>

<mosaic_0001>
module attributes {stable_mosaic.version = 11 : i64} {
  func.func @_conv_bn_relu_pool_kernel(%arg0: i32, %arg1: memref<1x32x96xf32, #tpu.memory_space<vmem>>, %arg2: memref<5x96x168xf32, #tpu.memory_space<vmem>>, %arg3: memref<1x168xf32, #tpu.memory_space<vmem>>, %arg4: memref<14x28xf32, #tpu.memory_space<vmem>>, %arg5: memref<14x28xf32, #tpu.memory_space<vmem>>, %arg6: memref<168x84xf32, #tpu.memory_space<vmem>>, %arg7: memref<168x84xf32, #tpu.memory_space<vmem>>, %arg8: memref<1x14x84xf32, #tpu.memory_space<vmem>>) attributes {dimension_semantics = [#tpu.dimension_semantics<parallel>], iteration_bounds = array<i64: 2>, scalar_prefetch = 0 : i64, scratch_operands = 0 : i64, tpu.core_type = #tpu.core_type<tc>, window_params = [{transform_indices = @transform_0, window_bounds = array<i64: 1, 32, 96>}, {pipeline_mode = #tpu.pipeline_mode<synchronous>, transform_indices = @transform_1, window_bounds = array<i64: 5, 96, 168>}, {pipeline_mode = #tpu.pipeline_mode<synchronous>, transform_indices = @transform_2, window_bounds = array<i64: 1, 168>}, {pipeline_mode = #tpu.pipeline_mode<synchronous>, transform_indices = @transform_3, window_bounds = array<i64: 14, 28>}, {pipeline_mode = #tpu.pipeline_mode<synchronous>, transform_indices = @transform_4, window_bounds = array<i64: 14, 28>}, {pipeline_mode = #tpu.pipeline_mode<synchronous>, transform_indices = @transform_5, window_bounds = array<i64: 168, 84>}, {pipeline_mode = #tpu.pipeline_mode<synchronous>, transform_indices = @transform_6, window_bounds = array<i64: 168, 84>}, {transform_indices = @transform_7, window_bounds = array<i64: 1, 14, 84>}]} {
    %cst = arith.constant 0.000000e+00 : f32
    %0 = vector.broadcast %cst : f32 to vector<28x168xf32>
    %c0 = arith.constant 0 : index
    %c0_0 = arith.constant 0 : index
    %c0_1 = arith.constant 0 : index
    %1 = vector.load %arg1[%c0, %c0_0, %c0_1] : memref<1x32x96xf32, #tpu.memory_space<vmem>>, vector<1x28x96xf32>
    %2 = vector.shape_cast %1 : vector<1x28x96xf32> to vector<28x96xf32>
    %c0_2 = arith.constant 0 : index
    %c0_3 = arith.constant 0 : index
    %c0_4 = arith.constant 0 : index
    %3 = vector.load %arg2[%c0_2, %c0_3, %c0_4] : memref<5x96x168xf32, #tpu.memory_space<vmem>>, vector<1x96x168xf32>
    %4 = vector.shape_cast %3 : vector<1x96x168xf32> to vector<96x168xf32>
    %cst_5 = arith.constant dense<0.000000e+00> : vector<28x168xf32>
    %5 = tpu.matmul %2, %4, %cst_5 {dimension_numbers = #tpu.dot_dimension_numbers<[1], [0], [0], [1], [0, 0, 1, 1], [], []>} : vector<28x96xf32>, vector<96x168xf32>, vector<28x168xf32> -> vector<28x168xf32>
    %6 = arith.addf %0, %5 : vector<28x168xf32>
    %c0_6 = arith.constant 0 : index
    %c1 = arith.constant 1 : index
    %c0_7 = arith.constant 0 : index
    %7 = vector.load %arg1[%c0_6, %c1, %c0_7] : memref<1x32x96xf32, #tpu.memory_space<vmem>>, vector<1x28x96xf32>
    %8 = vector.shape_cast %7 : vector<1x28x96xf32> to vector<28x96xf32>
    %c1_8 = arith.constant 1 : index
    %c0_9 = arith.constant 0 : index
    %c0_10 = arith.constant 0 : index
    %9 = vector.load %arg2[%c1_8, %c0_9, %c0_10] : memref<5x96x168xf32, #tpu.memory_space<vmem>>, vector<1x96x168xf32>
    %10 = vector.shape_cast %9 : vector<1x96x168xf32> to vector<96x168xf32>
    %cst_11 = arith.constant dense<0.000000e+00> : vector<28x168xf32>
    %11 = tpu.matmul %8, %10, %cst_11 {dimension_numbers = #tpu.dot_dimension_numbers<[1], [0], [0], [1], [0, 0, 1, 1], [], []>} : vector<28x96xf32>, vector<96x168xf32>, vector<28x168xf32> -> vector<28x168xf32>
    %12 = arith.addf %6, %11 : vector<28x168xf32>
    %c0_12 = arith.constant 0 : index
    %c2 = arith.constant 2 : index
    %c0_13 = arith.constant 0 : index
    %13 = vector.load %arg1[%c0_12, %c2, %c0_13] : memref<1x32x96xf32, #tpu.memory_space<vmem>>, vector<1x28x96xf32>
    %14 = vector.shape_cast %13 : vector<1x28x96xf32> to vector<28x96xf32>
    %c2_14 = arith.constant 2 : index
    %c0_15 = arith.constant 0 : index
    %c0_16 = arith.constant 0 : index
    %15 = vector.load %arg2[%c2_14, %c0_15, %c0_16] : memref<5x96x168xf32, #tpu.memory_space<vmem>>, vector<1x96x168xf32>
    %16 = vector.shape_cast %15 : vector<1x96x168xf32> to vector<96x168xf32>
    %cst_17 = arith.constant dense<0.000000e+00> : vector<28x168xf32>
    %17 = tpu.matmul %14, %16, %cst_17 {dimension_numbers = #tpu.dot_dimension_numbers<[1], [0], [0], [1], [0, 0, 1, 1], [], []>} : vector<28x96xf32>, vector<96x168xf32>, vector<28x168xf32> -> vector<28x168xf32>
    %18 = arith.addf %12, %17 : vector<28x168xf32>
    %c0_18 = arith.constant 0 : index
    %c3 = arith.constant 3 : index
    %c0_19 = arith.constant 0 : index
    %19 = vector.load %arg1[%c0_18, %c3, %c0_19] : memref<1x32x96xf32, #tpu.memory_space<vmem>>, vector<1x28x96xf32>
    %20 = vector.shape_cast %19 : vector<1x28x96xf32> to vector<28x96xf32>
    %c3_20 = arith.constant 3 : index
    %c0_21 = arith.constant 0 : index
    %c0_22 = arith.constant 0 : index
    %21 = vector.load %arg2[%c3_20, %c0_21, %c0_22] : memref<5x96x168xf32, #tpu.memory_space<vmem>>, vector<1x96x168xf32>
    %22 = vector.shape_cast %21 : vector<1x96x168xf32> to vector<96x168xf32>
    %cst_23 = arith.constant dense<0.000000e+00> : vector<28x168xf32>
    %23 = tpu.matmul %20, %22, %cst_23 {dimension_numbers = #tpu.dot_dimension_numbers<[1], [0], [0], [1], [0, 0, 1, 1], [], []>} : vector<28x96xf32>, vector<96x168xf32>, vector<28x168xf32> -> vector<28x168xf32>
    %24 = arith.addf %18, %23 : vector<28x168xf32>
    %c0_24 = arith.constant 0 : index
    %c4 = arith.constant 4 : index
    %c0_25 = arith.constant 0 : index
    %25 = vector.load %arg1[%c0_24, %c4, %c0_25] : memref<1x32x96xf32, #tpu.memory_space<vmem>>, vector<1x28x96xf32>
    %26 = vector.shape_cast %25 : vector<1x28x96xf32> to vector<28x96xf32>
    %c4_26 = arith.constant 4 : index
    %c0_27 = arith.constant 0 : index
    %c0_28 = arith.constant 0 : index
    %27 = vector.load %arg2[%c4_26, %c0_27, %c0_28] : memref<5x96x168xf32, #tpu.memory_space<vmem>>, vector<1x96x168xf32>
    %28 = vector.shape_cast %27 : vector<1x96x168xf32> to vector<96x168xf32>
    %cst_29 = arith.constant dense<0.000000e+00> : vector<28x168xf32>
    %29 = tpu.matmul %26, %28, %cst_29 {dimension_numbers = #tpu.dot_dimension_numbers<[1], [0], [0], [1], [0, 0, 1, 1], [], []>} : vector<28x96xf32>, vector<96x168xf32>, vector<28x168xf32> -> vector<28x168xf32>
    %30 = arith.addf %24, %29 : vector<28x168xf32>
    %c0_30 = arith.constant 0 : index
    %c0_31 = arith.constant 0 : index
    %31 = vector.load %arg3[%c0_30, %c0_31] : memref<1x168xf32, #tpu.memory_space<vmem>>, vector<1x168xf32>
    %32 = vector.broadcast %31 : vector<1x168xf32> to vector<28x168xf32>
    %33 = arith.addf %30, %32 : vector<28x168xf32>
    %cst_32 = arith.constant 0.000000e+00 : f32
    %34 = vector.broadcast %cst_32 : f32 to vector<28x168xf32>
    %35 = arith.maximumf %33, %34 : vector<28x168xf32>
    %c0_33 = arith.constant 0 : index
    %c0_34 = arith.constant 0 : index
    %36 = vector.load %arg4[%c0_33, %c0_34] : memref<14x28xf32, #tpu.memory_space<vmem>>, vector<14x28xf32>
    %cst_35 = arith.constant dense<0.000000e+00> : vector<14x168xf32>
    %37 = tpu.matmul %36, %35, %cst_35 {dimension_numbers = #tpu.dot_dimension_numbers<[1], [0], [0], [1], [0, 0, 1, 1], [], []>} : vector<14x28xf32>, vector<28x168xf32>, vector<14x168xf32> -> vector<14x168xf32>
    %c0_36 = arith.constant 0 : index
    %c0_37 = arith.constant 0 : index
    %38 = vector.load %arg5[%c0_36, %c0_37] : memref<14x28xf32, #tpu.memory_space<vmem>>, vector<14x28xf32>
    %cst_38 = arith.constant dense<0.000000e+00> : vector<14x168xf32>
    %39 = tpu.matmul %38, %35, %cst_38 {dimension_numbers = #tpu.dot_dimension_numbers<[1], [0], [0], [1], [0, 0, 1, 1], [], []>} : vector<14x28xf32>, vector<28x168xf32>, vector<14x168xf32> -> vector<14x168xf32>
    %40 = arith.maximumf %37, %39 : vector<14x168xf32>
    %c0_39 = arith.constant 0 : index
    %c0_40 = arith.constant 0 : index
    %41 = vector.load %arg6[%c0_39, %c0_40] : memref<168x84xf32, #tpu.memory_space<vmem>>, vector<168x84xf32>
    %cst_41 = arith.constant dense<0.000000e+00> : vector<14x84xf32>
    %42 = tpu.matmul %40, %41, %cst_41 {dimension_numbers = #tpu.dot_dimension_numbers<[1], [0], [0], [1], [0, 0, 1, 1], [], []>} : vector<14x168xf32>, vector<168x84xf32>, vector<14x84xf32> -> vector<14x84xf32>
    %c0_42 = arith.constant 0 : index
    %c0_43 = arith.constant 0 : index
    %43 = vector.load %arg7[%c0_42, %c0_43] : memref<168x84xf32, #tpu.memory_space<vmem>>, vector<168x84xf32>
    %cst_44 = arith.constant dense<0.000000e+00> : vector<14x84xf32>
    %44 = tpu.matmul %40, %43, %cst_44 {dimension_numbers = #tpu.dot_dimension_numbers<[1], [0], [0], [1], [0, 0, 1, 1], [], []>} : vector<14x168xf32>, vector<168x84xf32>, vector<14x84xf32> -> vector<14x84xf32>
    %45 = arith.maximumf %42, %44 : vector<14x84xf32>
    %c0_45 = arith.constant 0 : index
    %c0_46 = arith.constant 0 : index
    %c0_47 = arith.constant 0 : index
    %46 = vector.load %arg8[%c0_45, %c0_46, %c0_47] : memref<1x14x84xf32, #tpu.memory_space<vmem>>, vector<1x14x84xf32>
    %47 = vector.shape_cast %46 : vector<1x14x84xf32> to vector<14x84xf32>
    %48 = vector.shape_cast %45 : vector<14x84xf32> to vector<1x14x84xf32>
    tpu.vector_store %arg8[%c0_45, %c0_46, %c0_47], %48 {strides = array<i32>} : memref<1x14x84xf32, #tpu.memory_space<vmem>>, vector<1x14x84xf32>,
    return
  }
  func.func @transform_0(%arg0: i32) -> (i32, i32, i32) {
    %c0_i32 = arith.constant 0 : i32
    %c0_i32_0 = arith.constant 0 : i32
    %c0_i32_1 = arith.constant 0 : i32
    return %arg0, %c0_i32, %c0_i32_0 : i32, i32, i32
  }
  func.func @transform_1(%arg0: i32) -> (i32, i32, i32) {
    %c0_i32 = arith.constant 0 : i32
    %c0_i32_0 = arith.constant 0 : i32
    %c0_i32_1 = arith.constant 0 : i32
    %c0_i32_2 = arith.constant 0 : i32
    return %c0_i32, %c0_i32_0, %c0_i32_1 : i32, i32, i32
  }
  func.func @transform_2(%arg0: i32) -> (i32, i32) {
    %c0_i32 = arith.constant 0 : i32
    %c0_i32_0 = arith.constant 0 : i32
    %c0_i32_1 = arith.constant 0 : i32
    return %c0_i32, %c0_i32_0 : i32, i32
  }
  func.func @transform_3(%arg0: i32) -> (i32, i32) {
    %c0_i32 = arith.constant 0 : i32
    %c0_i32_0 = arith.constant 0 : i32
    %c0_i32_1 = arith.constant 0 : i32
    return %c0_i32, %c0_i32_0 : i32, i32
  }
  func.func @transform_4(%arg0: i32) -> (i32, i32) {
    %c0_i32 = arith.constant 0 : i32
    %c0_i32_0 = arith.constant 0 : i32
    %c0_i32_1 = arith.constant 0 : i32
    return %c0_i32, %c0_i32_0 : i32, i32
  }
  func.func @transform_5(%arg0: i32) -> (i32, i32) {
    %c0_i32 = arith.constant 0 : i32
    %c0_i32_0 = arith.constant 0 : i32
    %c0_i32_1 = arith.constant 0 : i32
    return %c0_i32, %c0_i32_0 : i32, i32
  }
  func.func @transform_6(%arg0: i32) -> (i32, i32) {
    %c0_i32 = arith.constant 0 : i32
    %c0_i32_0 = arith.constant 0 : i32
    %c0_i32_1 = arith.constant 0 : i32
    return %c0_i32, %c0_i32_0 : i32, i32
  }
  func.func @transform_7(%arg0: i32) -> (i32, i32, i32) {
    %c0_i32 = arith.constant 0 : i32
    %c0_i32_0 = arith.constant 0 : i32
    %c0_i32_1 = arith.constant 0 : i32
    return %arg0, %c0_i32, %c0_i32_0 : i32, i32, i32
  }
}

module attributes {stable_mosaic.version = 11 : i64} {
  func.func @_conv_bn_relu_pool_kernel(%arg0: i32, %arg1: memref<1x14x84xf32, #tpu.memory_space<vmem>>, %arg2: memref<5x84x160xf32, #tpu.memory_space<vmem>>, %arg3: memref<1x160xf32, #tpu.memory_space<vmem>>, %arg4: memref<5x10xf32, #tpu.memory_space<vmem>>, %arg5: memref<5x10xf32, #tpu.memory_space<vmem>>, %arg6: memref<160x80xf32, #tpu.memory_space<vmem>>, %arg7: memref<160x80xf32, #tpu.memory_space<vmem>>, %arg8: memref<1x5x80xf32, #tpu.memory_space<vmem>>) attributes {dimension_semantics = [#tpu.dimension_semantics<parallel>], iteration_bounds = array<i64: 2>, scalar_prefetch = 0 : i64, scratch_operands = 0 : i64, tpu.core_type = #tpu.core_type<tc>, window_params = [{transform_indices = @transform_0, window_bounds = array<i64: 1, 14, 84>}, {pipeline_mode = #tpu.pipeline_mode<synchronous>, transform_indices = @transform_1, window_bounds = array<i64: 5, 84, 160>}, {pipeline_mode = #tpu.pipeline_mode<synchronous>, transform_indices = @transform_2, window_bounds = array<i64: 1, 160>}, {pipeline_mode = #tpu.pipeline_mode<synchronous>, transform_indices = @transform_3, window_bounds = array<i64: 5, 10>}, {pipeline_mode = #tpu.pipeline_mode<synchronous>, transform_indices = @transform_4, window_bounds = array<i64: 5, 10>}, {pipeline_mode = #tpu.pipeline_mode<synchronous>, transform_indices = @transform_5, window_bounds = array<i64: 160, 80>}, {pipeline_mode = #tpu.pipeline_mode<synchronous>, transform_indices = @transform_6, window_bounds = array<i64: 160, 80>}, {transform_indices = @transform_7, window_bounds = array<i64: 1, 5, 80>}]} {
    %cst = arith.constant 0.000000e+00 : f32
    %0 = vector.broadcast %cst : f32 to vector<10x160xf32>
    %c0 = arith.constant 0 : index
    %c0_0 = arith.constant 0 : index
    %c0_1 = arith.constant 0 : index
    %1 = vector.load %arg1[%c0, %c0_0, %c0_1] : memref<1x14x84xf32, #tpu.memory_space<vmem>>, vector<1x10x84xf32>
    %2 = vector.shape_cast %1 : vector<1x10x84xf32> to vector<10x84xf32>
    %c0_2 = arith.constant 0 : index
    %c0_3 = arith.constant 0 : index
    %c0_4 = arith.constant 0 : index
    %3 = vector.load %arg2[%c0_2, %c0_3, %c0_4] : memref<5x84x160xf32, #tpu.memory_space<vmem>>, vector<1x84x160xf32>
    %4 = vector.shape_cast %3 : vector<1x84x160xf32> to vector<84x160xf32>
    %cst_5 = arith.constant dense<0.000000e+00> : vector<10x160xf32>
    %5 = tpu.matmul %2, %4, %cst_5 {dimension_numbers = #tpu.dot_dimension_numbers<[1], [0], [0], [1], [0, 0, 1, 1], [], []>} : vector<10x84xf32>, vector<84x160xf32>, vector<10x160xf32> -> vector<10x160xf32>
    %6 = arith.addf %0, %5 : vector<10x160xf32>
    %c0_6 = arith.constant 0 : index
    %c1 = arith.constant 1 : index
    %c0_7 = arith.constant 0 : index
    %7 = vector.load %arg1[%c0_6, %c1, %c0_7] : memref<1x14x84xf32, #tpu.memory_space<vmem>>, vector<1x10x84xf32>
    %8 = vector.shape_cast %7 : vector<1x10x84xf32> to vector<10x84xf32>
    %c1_8 = arith.constant 1 : index
    %c0_9 = arith.constant 0 : index
    %c0_10 = arith.constant 0 : index
    %9 = vector.load %arg2[%c1_8, %c0_9, %c0_10] : memref<5x84x160xf32, #tpu.memory_space<vmem>>, vector<1x84x160xf32>
    %10 = vector.shape_cast %9 : vector<1x84x160xf32> to vector<84x160xf32>
    %cst_11 = arith.constant dense<0.000000e+00> : vector<10x160xf32>
    %11 = tpu.matmul %8, %10, %cst_11 {dimension_numbers = #tpu.dot_dimension_numbers<[1], [0], [0], [1], [0, 0, 1, 1], [], []>} : vector<10x84xf32>, vector<84x160xf32>, vector<10x160xf32> -> vector<10x160xf32>
    %12 = arith.addf %6, %11 : vector<10x160xf32>
    %c0_12 = arith.constant 0 : index
    %c2 = arith.constant 2 : index
    %c0_13 = arith.constant 0 : index
    %13 = vector.load %arg1[%c0_12, %c2, %c0_13] : memref<1x14x84xf32, #tpu.memory_space<vmem>>, vector<1x10x84xf32>
    %14 = vector.shape_cast %13 : vector<1x10x84xf32> to vector<10x84xf32>
    %c2_14 = arith.constant 2 : index
    %c0_15 = arith.constant 0 : index
    %c0_16 = arith.constant 0 : index
    %15 = vector.load %arg2[%c2_14, %c0_15, %c0_16] : memref<5x84x160xf32, #tpu.memory_space<vmem>>, vector<1x84x160xf32>
    %16 = vector.shape_cast %15 : vector<1x84x160xf32> to vector<84x160xf32>
    %cst_17 = arith.constant dense<0.000000e+00> : vector<10x160xf32>
    %17 = tpu.matmul %14, %16, %cst_17 {dimension_numbers = #tpu.dot_dimension_numbers<[1], [0], [0], [1], [0, 0, 1, 1], [], []>} : vector<10x84xf32>, vector<84x160xf32>, vector<10x160xf32> -> vector<10x160xf32>
    %18 = arith.addf %12, %17 : vector<10x160xf32>
    %c0_18 = arith.constant 0 : index
    %c3 = arith.constant 3 : index
    %c0_19 = arith.constant 0 : index
    %19 = vector.load %arg1[%c0_18, %c3, %c0_19] : memref<1x14x84xf32, #tpu.memory_space<vmem>>, vector<1x10x84xf32>
    %20 = vector.shape_cast %19 : vector<1x10x84xf32> to vector<10x84xf32>
    %c3_20 = arith.constant 3 : index
    %c0_21 = arith.constant 0 : index
    %c0_22 = arith.constant 0 : index
    %21 = vector.load %arg2[%c3_20, %c0_21, %c0_22] : memref<5x84x160xf32, #tpu.memory_space<vmem>>, vector<1x84x160xf32>
    %22 = vector.shape_cast %21 : vector<1x84x160xf32> to vector<84x160xf32>
    %cst_23 = arith.constant dense<0.000000e+00> : vector<10x160xf32>
    %23 = tpu.matmul %20, %22, %cst_23 {dimension_numbers = #tpu.dot_dimension_numbers<[1], [0], [0], [1], [0, 0, 1, 1], [], []>} : vector<10x84xf32>, vector<84x160xf32>, vector<10x160xf32> -> vector<10x160xf32>
    %24 = arith.addf %18, %23 : vector<10x160xf32>
    %c0_24 = arith.constant 0 : index
    %c4 = arith.constant 4 : index
    %c0_25 = arith.constant 0 : index
    %25 = vector.load %arg1[%c0_24, %c4, %c0_25] : memref<1x14x84xf32, #tpu.memory_space<vmem>>, vector<1x10x84xf32>
    %26 = vector.shape_cast %25 : vector<1x10x84xf32> to vector<10x84xf32>
    %c4_26 = arith.constant 4 : index
    %c0_27 = arith.constant 0 : index
    %c0_28 = arith.constant 0 : index
    %27 = vector.load %arg2[%c4_26, %c0_27, %c0_28] : memref<5x84x160xf32, #tpu.memory_space<vmem>>, vector<1x84x160xf32>
    %28 = vector.shape_cast %27 : vector<1x84x160xf32> to vector<84x160xf32>
    %cst_29 = arith.constant dense<0.000000e+00> : vector<10x160xf32>
    %29 = tpu.matmul %26, %28, %cst_29 {dimension_numbers = #tpu.dot_dimension_numbers<[1], [0], [0], [1], [0, 0, 1, 1], [], []>} : vector<10x84xf32>, vector<84x160xf32>, vector<10x160xf32> -> vector<10x160xf32>
    %30 = arith.addf %24, %29 : vector<10x160xf32>
    %c0_30 = arith.constant 0 : index
    %c0_31 = arith.constant 0 : index
    %31 = vector.load %arg3[%c0_30, %c0_31] : memref<1x160xf32, #tpu.memory_space<vmem>>, vector<1x160xf32>
    %32 = vector.broadcast %31 : vector<1x160xf32> to vector<10x160xf32>
    %33 = arith.addf %30, %32 : vector<10x160xf32>
    %cst_32 = arith.constant 0.000000e+00 : f32
    %34 = vector.broadcast %cst_32 : f32 to vector<10x160xf32>
    %35 = arith.maximumf %33, %34 : vector<10x160xf32>
    %c0_33 = arith.constant 0 : index
    %c0_34 = arith.constant 0 : index
    %36 = vector.load %arg4[%c0_33, %c0_34] : memref<5x10xf32, #tpu.memory_space<vmem>>, vector<5x10xf32>
    %cst_35 = arith.constant dense<0.000000e+00> : vector<5x160xf32>
    %37 = tpu.matmul %36, %35, %cst_35 {dimension_numbers = #tpu.dot_dimension_numbers<[1], [0], [0], [1], [0, 0, 1, 1], [], []>} : vector<5x10xf32>, vector<10x160xf32>, vector<5x160xf32> -> vector<5x160xf32>
    %c0_36 = arith.constant 0 : index
    %c0_37 = arith.constant 0 : index
    %38 = vector.load %arg5[%c0_36, %c0_37] : memref<5x10xf32, #tpu.memory_space<vmem>>, vector<5x10xf32>
    %cst_38 = arith.constant dense<0.000000e+00> : vector<5x160xf32>
    %39 = tpu.matmul %38, %35, %cst_38 {dimension_numbers = #tpu.dot_dimension_numbers<[1], [0], [0], [1], [0, 0, 1, 1], [], []>} : vector<5x10xf32>, vector<10x160xf32>, vector<5x160xf32> -> vector<5x160xf32>
    %40 = arith.maximumf %37, %39 : vector<5x160xf32>
    %c0_39 = arith.constant 0 : index
    %c0_40 = arith.constant 0 : index
    %41 = vector.load %arg6[%c0_39, %c0_40] : memref<160x80xf32, #tpu.memory_space<vmem>>, vector<160x80xf32>
    %cst_41 = arith.constant dense<0.000000e+00> : vector<5x80xf32>
    %42 = tpu.matmul %40, %41, %cst_41 {dimension_numbers = #tpu.dot_dimension_numbers<[1], [0], [0], [1], [0, 0, 1, 1], [], []>} : vector<5x160xf32>, vector<160x80xf32>, vector<5x80xf32> -> vector<5x80xf32>
    %c0_42 = arith.constant 0 : index
    %c0_43 = arith.constant 0 : index
    %43 = vector.load %arg7[%c0_42, %c0_43] : memref<160x80xf32, #tpu.memory_space<vmem>>, vector<160x80xf32>
    %cst_44 = arith.constant dense<0.000000e+00> : vector<5x80xf32>
    %44 = tpu.matmul %40, %43, %cst_44 {dimension_numbers = #tpu.dot_dimension_numbers<[1], [0], [0], [1], [0, 0, 1, 1], [], []>} : vector<5x160xf32>, vector<160x80xf32>, vector<5x80xf32> -> vector<5x80xf32>
    %45 = arith.maximumf %42, %44 : vector<5x80xf32>
    %c0_45 = arith.constant 0 : index
    %c0_46 = arith.constant 0 : index
    %c0_47 = arith.constant 0 : index
    %46 = vector.load %arg8[%c0_45, %c0_46, %c0_47] : memref<1x5x80xf32, #tpu.memory_space<vmem>>, vector<1x5x80xf32>
    %47 = vector.shape_cast %46 : vector<1x5x80xf32> to vector<5x80xf32>
    %48 = vector.shape_cast %45 : vector<5x80xf32> to vector<1x5x80xf32>
    tpu.vector_store %arg8[%c0_45, %c0_46, %c0_47], %48 {strides = array<i32>} : memref<1x5x80xf32, #tpu.memory_space<vmem>>, vector<1x5x80xf32>,
    return
  }
  func.func @transform_0(%arg0: i32) -> (i32, i32, i32) {
    %c0_i32 = arith.constant 0 : i32
    %c0_i32_0 = arith.constant 0 : i32
    %c0_i32_1 = arith.constant 0 : i32
    return %arg0, %c0_i32, %c0_i32_0 : i32, i32, i32
  }
  func.func @transform_1(%arg0: i32) -> (i32, i32, i32) {
    %c0_i32 = arith.constant 0 : i32
    %c0_i32_0 = arith.constant 0 : i32
    %c0_i32_1 = arith.constant 0 : i32
    %c0_i32_2 = arith.constant 0 : i32
    return %c0_i32, %c0_i32_0, %c0_i32_1 : i32, i32, i32
  }
  func.func @transform_2(%arg0: i32) -> (i32, i32) {
    %c0_i32 = arith.constant 0 : i32
    %c0_i32_0 = arith.constant 0 : i32
    %c0_i32_1 = arith.constant 0 : i32
    return %c0_i32, %c0_i32_0 : i32, i32
  }
  func.func @transform_3(%arg0: i32) -> (i32, i32) {
    %c0_i32 = arith.constant 0 : i32
    %c0_i32_0 = arith.constant 0 : i32
    %c0_i32_1 = arith.constant 0 : i32
    return %c0_i32, %c0_i32_0 : i32, i32
  }
  func.func @transform_4(%arg0: i32) -> (i32, i32) {
    %c0_i32 = arith.constant 0 : i32
    %c0_i32_0 = arith.constant 0 : i32
    %c0_i32_1 = arith.constant 0 : i32
    return %c0_i32, %c0_i32_0 : i32, i32
  }
  func.func @transform_5(%arg0: i32) -> (i32, i32) {
    %c0_i32 = arith.constant 0 : i32
    %c0_i32_0 = arith.constant 0 : i32
    %c0_i32_1 = arith.constant 0 : i32
    return %c0_i32, %c0_i32_0 : i32, i32
  }
  func.func @transform_6(%arg0: i32) -> (i32, i32) {
    %c0_i32 = arith.constant 0 : i32
    %c0_i32_0 = arith.constant 0 : i32
    %c0_i32_1 = arith.constant 0 : i32
    return %c0_i32, %c0_i32_0 : i32, i32
  }
  func.func @transform_7(%arg0: i32) -> (i32, i32, i32) {
    %c0_i32 = arith.constant 0 : i32
    %c0_i32_0 = arith.constant 0 : i32
    %c0_i32_1 = arith.constant 0 : i32
    return %arg0, %c0_i32, %c0_i32_0 : i32, i32, i32
  }
}

module attributes {stable_mosaic.version = 11 : i64} {
  func.func @_fc_chain_kernel(%arg0: i32, %arg1: memref<8x400xf32, #tpu.memory_space<vmem>>, %arg2: memref<400x120xf32, #tpu.memory_space<vmem>>, %arg3: memref<1x120xf32, #tpu.memory_space<vmem>>, %arg4: memref<120x84xf32, #tpu.memory_space<vmem>>, %arg5: memref<1x84xf32, #tpu.memory_space<vmem>>, %arg6: memref<84x128xf32, #tpu.memory_space<vmem>>, %arg7: memref<1x128xf32, #tpu.memory_space<vmem>>, %arg8: memref<8x128xf32, #tpu.memory_space<vmem>>) attributes {dimension_semantics = [#tpu.dimension_semantics<parallel>], iteration_bounds = array<i64: 1>, scalar_prefetch = 0 : i64, scratch_operands = 0 : i64, tpu.core_type = #tpu.core_type<tc>, window_params = [{transform_indices = @transform_0, window_bounds = array<i64: 8, 400>}, {pipeline_mode = #tpu.pipeline_mode<synchronous>, transform_indices = @transform_1, window_bounds = array<i64: 400, 120>}, {pipeline_mode = #tpu.pipeline_mode<synchronous>, transform_indices = @transform_2, window_bounds = array<i64: 1, 120>}, {pipeline_mode = #tpu.pipeline_mode<synchronous>, transform_indices = @transform_3, window_bounds = array<i64: 120, 84>}, {pipeline_mode = #tpu.pipeline_mode<synchronous>, transform_indices = @transform_4, window_bounds = array<i64: 1, 84>}, {pipeline_mode = #tpu.pipeline_mode<synchronous>, transform_indices = @transform_5, window_bounds = array<i64: 84, 128>}, {pipeline_mode = #tpu.pipeline_mode<synchronous>, transform_indices = @transform_6, window_bounds = array<i64: 1, 128>}, {transform_indices = @transform_7, window_bounds = array<i64: 8, 128>}]} {
    %c0 = arith.constant 0 : index
    %c0_0 = arith.constant 0 : index
    %0 = vector.load %arg1[%c0, %c0_0] : memref<8x400xf32, #tpu.memory_space<vmem>>, vector<8x400xf32>
    %c0_1 = arith.constant 0 : index
    %c0_2 = arith.constant 0 : index
    %1 = vector.load %arg2[%c0_1, %c0_2] : memref<400x120xf32, #tpu.memory_space<vmem>>, vector<400x120xf32>
    %cst = arith.constant dense<0.000000e+00> : vector<8x120xf32>
    %2 = tpu.matmul %0, %1, %cst {dimension_numbers = #tpu.dot_dimension_numbers<[1], [0], [0], [1], [0, 0, 1, 1], [], []>} : vector<8x400xf32>, vector<400x120xf32>, vector<8x120xf32> -> vector<8x120xf32>
    %c0_3 = arith.constant 0 : index
    %c0_4 = arith.constant 0 : index
    %3 = vector.load %arg3[%c0_3, %c0_4] : memref<1x120xf32, #tpu.memory_space<vmem>>, vector<1x120xf32>
    %4 = vector.broadcast %3 : vector<1x120xf32> to vector<8x120xf32>
    %5 = arith.addf %2, %4 : vector<8x120xf32>
    %c0_5 = arith.constant 0 : index
    %c0_6 = arith.constant 0 : index
    %6 = vector.load %arg4[%c0_5, %c0_6] : memref<120x84xf32, #tpu.memory_space<vmem>>, vector<120x84xf32>
    %cst_7 = arith.constant dense<0.000000e+00> : vector<8x84xf32>
    %7 = tpu.matmul %5, %6, %cst_7 {dimension_numbers = #tpu.dot_dimension_numbers<[1], [0], [0], [1], [0, 0, 1, 1], [], []>} : vector<8x120xf32>, vector<120x84xf32>, vector<8x84xf32> -> vector<8x84xf32>
    %c0_8 = arith.constant 0 : index
    %c0_9 = arith.constant 0 : index
    %8 = vector.load %arg5[%c0_8, %c0_9] : memref<1x84xf32, #tpu.memory_space<vmem>>, vector<1x84xf32>
    %9 = vector.broadcast %8 : vector<1x84xf32> to vector<8x84xf32>
    %10 = arith.addf %7, %9 : vector<8x84xf32>
    %c0_10 = arith.constant 0 : index
    %c0_11 = arith.constant 0 : index
    %11 = vector.load %arg6[%c0_10, %c0_11] : memref<84x128xf32, #tpu.memory_space<vmem>>, vector<84x128xf32>
    %cst_12 = arith.constant dense<0.000000e+00> : vector<8x128xf32>
    %12 = tpu.matmul %10, %11, %cst_12 {dimension_numbers = #tpu.dot_dimension_numbers<[1], [0], [0], [1], [0, 0, 1, 1], [], []>} : vector<8x84xf32>, vector<84x128xf32>, vector<8x128xf32> -> vector<8x128xf32>
    %c0_13 = arith.constant 0 : index
    %c0_14 = arith.constant 0 : index
    %13 = vector.load %arg7[%c0_13, %c0_14] : memref<1x128xf32, #tpu.memory_space<vmem>>, vector<1x128xf32>
    %14 = vector.broadcast %13 : vector<1x128xf32> to vector<8x128xf32>
    %15 = arith.addf %12, %14 : vector<8x128xf32>
    %c0_15 = arith.constant 0 : index
    %c0_16 = arith.constant 0 : index
    %16 = vector.load %arg8[%c0_15, %c0_16] : memref<8x128xf32, #tpu.memory_space<vmem>>, vector<8x128xf32>
    tpu.vector_store %arg8[%c0_15, %c0_16], %15 {strides = array<i32>} : memref<8x128xf32, #tpu.memory_space<vmem>>, vector<8x128xf32>,
    return
  }
  func.func @transform_0(%arg0: i32) -> (i32, i32) {
    %c0_i32 = arith.constant 0 : i32
    %c0_i32_0 = arith.constant 0 : i32
    return %arg0, %c0_i32 : i32, i32
  }
  func.func @transform_1(%arg0: i32) -> (i32, i32) {
    %c0_i32 = arith.constant 0 : i32
    %c0_i32_0 = arith.constant 0 : i32
    %c0_i32_1 = arith.constant 0 : i32
    return %c0_i32, %c0_i32_0 : i32, i32
  }
  func.func @transform_2(%arg0: i32) -> (i32, i32) {
    %c0_i32 = arith.constant 0 : i32
    %c0_i32_0 = arith.constant 0 : i32
    %c0_i32_1 = arith.constant 0 : i32
    return %c0_i32, %c0_i32_0 : i32, i32
  }
  func.func @transform_3(%arg0: i32) -> (i32, i32) {
    %c0_i32 = arith.constant 0 : i32
    %c0_i32_0 = arith.constant 0 : i32
    %c0_i32_1 = arith.constant 0 : i32
    return %c0_i32, %c0_i32_0 : i32, i32
  }
  func.func @transform_4(%arg0: i32) -> (i32, i32) {
    %c0_i32 = arith.constant 0 : i32
    %c0_i32_0 = arith.constant 0 : i32
    %c0_i32_1 = arith.constant 0 : i32
    return %c0_i32, %c0_i32_0 : i32, i32
  }
  func.func @transform_5(%arg0: i32) -> (i32, i32) {
    %c0_i32 = arith.constant 0 : i32
    %c0_i32_0 = arith.constant 0 : i32
    %c0_i32_1 = arith.constant 0 : i32
    return %c0_i32, %c0_i32_0 : i32, i32
  }
  func.func @transform_6(%arg0: i32) -> (i32, i32) {
    %c0_i32 = arith.constant 0 : i32
    %c0_i32_0 = arith.constant 0 : i32
    %c0_i32_1 = arith.constant 0 : i32
    return %c0_i32, %c0_i32_0 : i32, i32
  }
  func.func @transform_7(%arg0: i32) -> (i32, i32) {
    %c0_i32 = arith.constant 0 : i32
    %c0_i32_0 = arith.constant 0 : i32
    return %arg0, %c0_i32 : i32, i32
  }
}

</mosaic_0001>

<bundles_post_ra>
// kernel: lenet_forward.3
= control target key start
LH: loop header
LB: loop body
LE: loop exit
PB: predicated region body
PF: predicated region fallthrough
CT: control target
= control target key end

     0   :  { %s1363_s24 = smov 0   ;;  %s1969_s0 = inlined_call_operand.vmem [shape: f32[2,32,96], index: 0, kind: input, shape index: {}]   ;;  %s1970_s1 = inlined_call_operand.vmem [shape: f32[5,96,168], index: 1, kind: input, shape index: {}]   ;;  %s1971_s2 = inlined_call_operand.vmem [shape: f32[1,168], index: 2, kind: input, shape index: {}]   ;;  %s1972_s3 = inlined_call_operand.vmem [shape: f32[14,28], index: 3, kind: input, shape index: {}]   ;;  %s1973_s4 = inlined_call_operand.vmem [shape: f32[14,28], index: 4, kind: input, shape index: {}]   ;;  %s1974_s5 = inlined_call_operand.vmem [shape: f32[168,84], index: 5, kind: input, shape index: {}]   ;;  %s1975_s6 = inlined_call_operand.vmem [shape: f32[168,84], index: 6, kind: input, shape index: {}]   ;;  %s1976_s7 = inlined_call_operand.vmem [shape: f32[2,14,84], index: 7, kind: output, shape index: {}]  }
   0x1 LB: > { %s1142_s25 = sadd.s32 4294967295, %s1321_s24   ;;  %p1146_p0 = scmp.ge.s32.totalorder %s1321_s24, 1  ;;  %s1321_s24 = sphi %s1363_s24, %s17_s24  }
   0x2   : > { %p237_p1 = scmp.lt.s32.totalorder %s1321_s24, 3 }
   0x4   : > { %p238_p2 = pnand %p1146_p0, %p237_p1 }
   0x5   : > { %p1439_p3 = scmp.lt.s32.totalorder (!%p238_p2), %s1142_s25, 1 }
   0x6   : > { %241 = sbr.rel (%p238_p2) target bundleno = 558 (0x22e), region = 48 }
   0xb   : > { %v1173_v0 = vld [vmem:[%s1970_s1 + $0x170] sm:$0xff]  ;;  %v1174_v1 = vld [vmem:[%s1970_s1 + $0x178] sm:$0xff]  ;;  %v1171_v4 = vld [vmem:[%s1970_s1 + $0x160] sm:$0xff]  ;;  %s1979_s25 = smov (!%p1439_p3, %s1142_s25), 1  ;;  %vm336_vm0 = vcmask 785408   ;;  %vm829_vm1 = vcmask 1043456  }
   0xc   : > { %v305_v2 = vld [vmem:[%s1970_s1 + $0xb0] sm:$0xff]  ;;  %353 = vmatpush.msra.mxu0 %v1173_v0  ;;  %382 = vmatpush.msra.mxu1 %v1174_v1  ;;  %v306_v3 = vld [vmem:[%s1970_s1 + $0xb8] sm:$0xff]  ;;  %v1172_v5 = vld [vmem:[%s1970_s1 + $0x168] sm:$0xff]  ;;  %s1305_s17 = sshll.u32 %s1979_s25, 5  ;;  %vm822_vm2 = vcmask 228352   ;;  %vm961_vm3 = vcmask 326656  }
   0xd   : > { %423 = vmatpush.msra.mxu2 %v305_v2  ;;  %452 = vmatpush.msra.mxu3 %v306_v3  ;;  %v303_v6 = vld [vmem:[%s1970_s1 + $0xa0] sm:$0xff]  ;;  %v304_v7 = vld [vmem:[%s1970_s1 + $0xa8] sm:$0xff]  ;;  %v1169_v8 = vld [vmem:[%s1970_s1 + $0x150] sm:$0xff]  ;;  %s1519_s11 = scalar_lea.vmem %s1969_s0, %s1305_s17  ;;  %s1306_s13 = sshll.u32 %s1979_s25, 4  ;;  %vm1083_vm4 = vcmask 687104   ;;  %vm1085_vm5 = vcmask 685056  }
   0xe   : > { %354 = vmatpush.msra.mxu0 %v1171_v4  ;;  %383 = vmatpush.msra.mxu1 %v1172_v5  ;;  %v1170_v9 = vld [vmem:[%s1970_s1 + $0x158] sm:$0xff]  ;;  %v301_v10 = vld [vmem:[%s1970_s1 + $0x90] sm:$0xff]  ;;  %v1167_v12 = vld [vmem:[%s1970_s1 + $0x140] sm:$0xff]  ;;  %s278_s16 = scalar_lea.vmem %s1976_s7, %s1306_s13 }
   0xf   : > { %v302_v11 = vld [vmem:[%s1970_s1 + $0x98] sm:$0xff]  ;;  %424 = vmatpush.msra.mxu2 %v303_v6  ;;  %453 = vmatpush.msra.mxu3 %v304_v7  ;;  %v1168_v13 = vld [vmem:[%s1970_s1 + $0x148] sm:$0xff]  ;;  %v299_v14 = vld [vmem:[%s1970_s1 + $0x80] sm:$0xff] }
  0x10   : > { %355 = vmatpush.msra.mxu0 %v1169_v8  ;;  %384 = vmatpush.msra.mxu1 %v1170_v9  ;;  %v300_v15 = vld [vmem:[%s1970_s1 + $0x88] sm:$0xff]  ;;  %v1165_v16 = vld [vmem:[%s1970_s1 + $0x130] sm:$0xff]  ;;  %v1166_v17 = vld [vmem:[%s1970_s1 + $0x138] sm:$0xff] }
  0x11   : > { %425 = vmatpush.msra.mxu2 %v301_v10  ;;  %454 = vmatpush.msra.mxu3 %v302_v11  ;;  %v297_v18 = vld [vmem:[%s1970_s1 + $0x70] sm:$0xff]  ;;  %v298_v19 = vld [vmem:[%s1970_s1 + $0x78] sm:$0xff]  ;;  %v1163_v20 = vld [vmem:[%s1970_s1 + $0x120] sm:$0xff] }
  0x12   : > { %356 = vmatpush.msra.mxu0 %v1167_v12  ;;  %385 = vmatpush.msra.mxu1 %v1168_v13  ;;  %v1164_v21 = vld [vmem:[%s1970_s1 + $0x128] sm:$0xff]  ;;  %v295_v22 = vld [vmem:[%s1970_s1 + $0x60] sm:$0xff]  ;;  %v1161_v24 = vld [vmem:[%s1970_s1 + $0x110] sm:$0xff] }
  0x13   : > { %426 = vmatpush.msra.mxu2 %v299_v14  ;;  %455 = vmatpush.msra.mxu3 %v300_v15  ;;  %v296_v23 = vld [vmem:[%s1970_s1 + $0x68] sm:$0xff]  ;;  %v1162_v25 = vld [vmem:[%s1970_s1 + $0x118] sm:$0xff]  ;;  %v293_v26 = vld [vmem:[%s1970_s1 + $0x50] sm:$0xff] }
  0x14   : > { %357 = vmatpush.msra.mxu0 %v1165_v16  ;;  %386 = vmatpush.msra.mxu1 %v1166_v17  ;;  %v294_v27 = vld [vmem:[%s1970_s1 + $0x58] sm:$0xff]  ;;  %v1159_v28 = vld [vmem:[%s1970_s1 + $0x100] sm:$0xff]  ;;  %v1160_v29 = vld [vmem:[%s1970_s1 + $0x108] sm:$0xff] }
  0x15   : > { %427 = vmatpush.msra.mxu2 %v297_v18  ;;  %456 = vmatpush.msra.mxu3 %v298_v19  ;;  %v291_v30 = vld [vmem:[%s1970_s1 + $0x40] sm:$0xff]  ;;  %v292_v31 = vld [vmem:[%s1970_s1 + $0x48] sm:$0xff]  ;;  %v1157_v32 = vld [vmem:[%s1970_s1 + $0xf0] sm:$0xff] }
  0x16   : > { %358 = vmatpush.msra.mxu0 %v1163_v20  ;;  %387 = vmatpush.msra.mxu1 %v1164_v21  ;;  %v1158_v33 = vld [vmem:[%s1970_s1 + $0xf8] sm:$0xff]  ;;  %v289_v34 = vld [vmem:[%s1970_s1 + $0x30] sm:$0xff]  ;;  %v1155_v36 = vld [vmem:[%s1970_s1 + $0xe0] sm:$0xff] }
  0x17   : > { %428 = vmatpush.msra.mxu2 %v295_v22  ;;  %457 = vmatpush.msra.mxu3 %v296_v23  ;;  %v290_v35 = vld [vmem:[%s1970_s1 + $0x38] sm:$0xff]  ;;  %v1156_v37 = vld [vmem:[%s1970_s1 + $0xe8] sm:$0xff]  ;;  %v287_v38 = vld [vmem:[%s1970_s1 + $0x20] sm:$0xff] }
  0x18   : > { %359 = vmatpush.msra.mxu0 %v1161_v24  ;;  %388 = vmatpush.msra.mxu1 %v1162_v25  ;;  %v288_v39 = vld [vmem:[%s1970_s1 + $0x28] sm:$0xff]  ;;  %v1153_v40 = vld [vmem:[%s1970_s1 + $0xd0] sm:$0xff]  ;;  %v1154_v41 = vld [vmem:[%s1970_s1 + $0xd8] sm:$0xff] }
  0x19   : > { %429 = vmatpush.msra.mxu2 %v293_v26  ;;  %458 = vmatpush.msra.mxu3 %v294_v27  ;;  %v285_v42 = vld [vmem:[%s1970_s1 + $0x10] sm:$0xff]  ;;  %v286_v43 = vld [vmem:[%s1970_s1 + $0x18] sm:$0xff]  ;;  %v1151_v44 = vld [vmem:[%s1970_s1 + $0xc0] sm:$0xff] }
  0x1a   : > { %360 = vmatpush.msra.mxu0 %v1159_v28  ;;  %389 = vmatpush.msra.mxu1 %v1160_v29  ;;  %v1152_v45 = vld [vmem:[%s1970_s1 + $0xc8] sm:$0xff]  ;;  %v283_v46 = vld [vmem:[%s1970_s1] sm:$0xff]  ;;  %v1213_v50 = vld [vmem:[%s1970_s1 + $0x230] sm:$0xff] }
  0x1b   : > { %430 = vmatpush.msra.mxu2 %v291_v30  ;;  %459 = vmatpush.msra.mxu3 %v292_v31  ;;  %v284_v47 = vld [vmem:[%s1970_s1 + $0x8] sm:$0xff]  ;;  %v279_v49 = vld [vmem:[%s1519_s11] sm:$0xff]  ;;  %v1214_v51 = vld [vmem:[%s1970_s1 + $0x238] sm:$0xff] }
  0x1c   : > { %361 = vmatpush.msra.mxu0 %v1157_v32  ;;  %390 = vmatpush.msra.mxu1 %v1158_v33  ;;  %v307_v48 = vld [vmem:[%s1519_s11 + $0x1] sm:$0xff]  ;;  %v1245_v52 = vld [vmem:[%s1970_s1 + $0x2f0] sm:$0xff]  ;;  %v1246_v53 = vld [vmem:[%s1970_s1 + $0x2f8] sm:$0xff] }
  0x1d   : > { %431 = vmatpush.msra.mxu2 %v289_v34  ;;  %460 = vmatpush.msra.mxu3 %v290_v35  ;;  %v1211_v54 = vld [vmem:[%s1970_s1 + $0x220] sm:$0xff]  ;;  %v1212_v55 = vld [vmem:[%s1970_s1 + $0x228] sm:$0xff]  ;;  %v1209_v58 = vld [vmem:[%s1970_s1 + $0x210] sm:$0xff] }
  0x1e   : > { %362 = vmatpush.msra.mxu0 %v1155_v36  ;;  %391 = vmatpush.msra.mxu1 %v1156_v37  ;;  %v1243_v56 = vld [vmem:[%s1970_s1 + $0x2e0] sm:$0xff]  ;;  %v1244_v57 = vld [vmem:[%s1970_s1 + $0x2e8] sm:$0xff]  ;;  %v1210_v59 = vld [vmem:[%s1970_s1 + $0x218] sm:$0xff] }
  0x1f   : > { %432 = vmatpush.msra.mxu2 %v287_v38  ;;  %461 = vmatpush.msra.mxu3 %v288_v39  ;;  %v1241_v60 = vld [vmem:[%s1970_s1 + $0x2d0] sm:$0xff]  ;;  %v1242_v61 = vld [vmem:[%s1970_s1 + $0x2d8] sm:$0xff]  ;;  %v280_v63 = vld [vmem:[%s1519_s11 + $0x8] sm:$0xff] }
  0x20   : > { %363 = vmatpush.msra.mxu0 %v1153_v40  ;;  %392 = vmatpush.msra.mxu1 %v1154_v41  ;;  %v308_v62 = vld [vmem:[%s1519_s11 + $0x9] sm:$0xff]  ;;  %v1207_v0 = vld [vmem:[%s1970_s1 + $0x200] sm:$0xff]  ;;  %v1206_v5 = vld [vmem:[%s1970_s1 + $0x1f8] sm:$0xff] }
  0x21   : > { %433 = vmatpush.msra.mxu2 %v285_v42  ;;  %462 = vmatpush.msra.mxu3 %v286_v43  ;;  %v1208_v1 = vld [vmem:[%s1970_s1 + $0x208] sm:$0xff]  ;;  %v1239_v2 = vld [vmem:[%s1970_s1 + $0x2c0] sm:$0xff]  ;;  %v1205_v4 = vld [vmem:[%s1970_s1 + $0x1f0] sm:$0xff] }
  0x22   : > { %364 = vmatpush.msra.mxu0 %v1151_v44  ;;  %393 = vmatpush.msra.mxu1 %v1152_v45  ;;  %v1240_v3 = vld [vmem:[%s1970_s1 + $0x2c8] sm:$0xff]  ;;  %v1237_v6 = vld [vmem:[%s1970_s1 + $0x2b0] sm:$0xff]  ;;  %v1238_v7 = vld [vmem:[%s1970_s1 + $0x2b8] sm:$0xff] }
  0x23   : > { %434 = vmatpush.msra.mxu2 %v283_v46  ;;  %463 = vmatpush.msra.mxu3 %v284_v47  ;;  %v1203_v8 = vld [vmem:[%s1970_s1 + $0x1e0] sm:$0xff]  ;;  %v1204_v9 = vld [vmem:[%s1970_s1 + $0x1e8] sm:$0xff]  ;;  %v309_v12 = vld [vmem:[%s1519_s11 + $0x11] sm:$0xff] }
  0x24   : > { %1175 = vmatmul.msk.f32.vlgmr.msra.gmra.mxu0 %vm336_vm0, %v307_v48  ;;  %1179 = vmatmul.msk.f32.vlgmr.msra.gmra.mxu1 %vm336_vm0, %v307_v48  ;;  %v1235_v10 = vld [vmem:[%s1970_s1 + $0x2a0] sm:$0xff]  ;;  %v1236_v11 = vld [vmem:[%s1970_s1 + $0x2a8] sm:$0xff]  ;;  %v281_v13 = vld [vmem:[%s1519_s11 + $0x10] sm:$0xff] }
  0x25   : > { %1183 = vmatmul.msk.f32.vlgmr.msra.gmra.mxu2 %vm336_vm0, %v279_v49  ;;  %1187 = vmatmul.msk.f32.vlgmr.msra.gmra.mxu3 %vm336_vm0, %v279_v49  ;;  %v1201_v14 = vld [vmem:[%s1970_s1 + $0x1d0] sm:$0xff]  ;;  %v1202_v15 = vld [vmem:[%s1970_s1 + $0x1d8] sm:$0xff]  ;;  %v1199_v18 = vld [vmem:[%s1970_s1 + $0x1c0] sm:$0xff] }
  0x26   : > { %522 = vmatpush.msrb.mxu0 %v1213_v50  ;;  %551 = vmatpush.msrb.mxu1 %v1214_v51  ;;  %v1233_v16 = vld [vmem:[%s1970_s1 + $0x290] sm:$0xff]  ;;  %v1234_v17 = vld [vmem:[%s1970_s1 + $0x298] sm:$0xff]  ;;  %v1200_v19 = vld [vmem:[%s1970_s1 + $0x1c8] sm:$0xff] }
  0x27   : > { %629 = vmatpush.msrb.mxu2 %v1245_v52  ;;  %658 = vmatpush.msrb.mxu3 %v1246_v53  ;;  %v1231_v20 = vld [vmem:[%s1970_s1 + $0x280] sm:$0xff]  ;;  %v1232_v21 = vld [vmem:[%s1970_s1 + $0x288] sm:$0xff]  ;;  %v1197_v22 = vld [vmem:[%s1970_s1 + $0x1b0] sm:$0xff] }
  0x28   : > { %523 = vmatpush.msrb.mxu0 %v1211_v54  ;;  %552 = vmatpush.msrb.mxu1 %v1212_v55  ;;  %v1198_v23 = vld [vmem:[%s1970_s1 + $0x1b8] sm:$0xff]  ;;  %v1229_v24 = vld [vmem:[%s1970_s1 + $0x270] sm:$0xff]  ;;  %v1195_v28 = vld [vmem:[%s1970_s1 + $0x1a0] sm:$0xff] }
  0x29   : > { %630 = vmatpush.msrb.mxu2 %v1243_v56  ;;  %659 = vmatpush.msrb.mxu3 %v1244_v57  ;;  %v1230_v25 = vld [vmem:[%s1970_s1 + $0x278] sm:$0xff]  ;;  %v1196_v29 = vld [vmem:[%s1970_s1 + $0x1a8] sm:$0xff]  ;;  %v1227_v30 = vld [vmem:[%s1970_s1 + $0x260] sm:$0xff] }
  0x2a   : > { %524 = vmatpush.msrb.mxu0 %v1209_v58  ;;  %553 = vmatpush.msrb.mxu1 %v1210_v59  ;;  %v310_v26 = vld [vmem:[%s1519_s11 + $0x19] sm:$0xf]  ;;  %v1228_v31 = vld [vmem:[%s1970_s1 + $0x268] sm:$0xff]  ;;  %v1193_v32 = vld [vmem:[%s1970_s1 + $0x190] sm:$0xff] }
  0x2b   : > { %631 = vmatpush.msrb.mxu2 %v1241_v60  ;;  %660 = vmatpush.msrb.mxu3 %v1242_v61  ;;  %v282_v27 = vld [vmem:[%s1519_s11 + $0x18] sm:$0xf]  ;;  %v1225_v34 = vld [vmem:[%s1970_s1 + $0x250] sm:$0xff]  ;;  %v1191_v36 = vld [vmem:[%s1970_s1 + $0x180] sm:$0xff] }
  0x2c   : > { %1176 = vmatmul.msk.f32.gmra.mxu0 %vm336_vm0, %v308_v62  ;;  %1180 = vmatmul.msk.f32.gmra.mxu1 %vm336_vm0, %v308_v62  ;;  %v1194_v33 = vld [vmem:[%s1970_s1 + $0x198] sm:$0xff]  ;;  %v1192_v37 = vld [vmem:[%s1970_s1 + $0x188] sm:$0xff]  ;;  %v1223_v38 = vld [vmem:[%s1970_s1 + $0x240] sm:$0xff] }
  0x2d   : > { %1184 = vmatmul.msk.f32.gmra.mxu2 %vm336_vm0, %v280_v63  ;;  %1188 = vmatmul.msk.f32.gmra.mxu3 %vm336_vm0, %v280_v63  ;;  %v1226_v35 = vld [vmem:[%s1970_s1 + $0x258] sm:$0xff]  ;;  %v1224_v39 = vld [vmem:[%s1970_s1 + $0x248] sm:$0xff]  ;;  %v1277_v42 = vld [vmem:[%s1970_s1 + $0x3b0] sm:$0xff] }
  0x2e   : > { %525 = vmatpush.msrb.mxu0 %v1207_v0  ;;  %554 = vmatpush.msrb.mxu1 %v1208_v1  ;;  %v477_v40 = vld [vmem:[%s1519_s11 + $0x2] sm:$0xff]  ;;  %v1278_v43 = vld [vmem:[%s1970_s1 + $0x3b8] sm:$0xff]  ;;  %v1273_v46 = vld [vmem:[%s1970_s1 + $0x390] sm:$0xff] }
  0x2f   : > { %632 = vmatpush.msrb.mxu2 %v1239_v2  ;;  %661 = vmatpush.msrb.mxu3 %v1240_v3  ;;  %v584_v41 = vld [vmem:[%s1519_s11 + $0x3] sm:$0xff]  ;;  %v1274_v47 = vld [vmem:[%s1970_s1 + $0x398] sm:$0xff]  ;;  %v585_v49 = vld [vmem:[%s1519_s11 + $0xb] sm:$0xff] }
  0x30   : > { %526 = vmatpush.msrb.mxu0 %v1205_v4  ;;  %555 = vmatpush.msrb.mxu1 %v1206_v5  ;;  %v1275_v44 = vld [vmem:[%s1970_s1 + $0x3a0] sm:$0xff]  ;;  %v1276_v45 = vld [vmem:[%s1970_s1 + $0x3a8] sm:$0xff]  ;;  %v1269_v52 = vld [vmem:[%s1970_s1 + $0x370] sm:$0xff] }
  0x31   : > { %633 = vmatpush.msrb.mxu2 %v1237_v6  ;;  %662 = vmatpush.msrb.mxu3 %v1238_v7  ;;  %v478_v48 = vld [vmem:[%s1519_s11 + $0xa] sm:$0xff]  ;;  %v1271_v50 = vld [vmem:[%s1970_s1 + $0x380] sm:$0xff]  ;;  %v1270_v53 = vld [vmem:[%s1970_s1 + $0x378] sm:$0xff] }
  0x32   : > { %527 = vmatpush.msrb.mxu0 %v1203_v8  ;;  %556 = vmatpush.msrb.mxu1 %v1204_v9  ;;  %v1272_v51 = vld [vmem:[%s1970_s1 + $0x388] sm:$0xff]  ;;  %v1267_v54 = vld [vmem:[%s1970_s1 + $0x360] sm:$0xff]  ;;  %v479_v56 = vld [vmem:[%s1519_s11 + $0x12] sm:$0xff] }
  0x33   : > { %634 = vmatpush.msrb.mxu2 %v1235_v10  ;;  %663 = vmatpush.msrb.mxu3 %v1236_v11  ;;  %v1268_v55 = vld [vmem:[%s1970_s1 + $0x368] sm:$0xff]  ;;  %v586_v57 = vld [vmem:[%s1519_s11 + $0x13] sm:$0xff]  ;;  %v1263_v60 = vld [vmem:[%s1970_s1 + $0x340] sm:$0xff] }
  0x34   : > { %1177 = vmatmul.msk.f32.gmra.mxu0 %vm336_vm0, %v309_v12  ;;  %1181 = vmatmul.msk.f32.gmra.mxu1 %vm336_vm0, %v309_v12  ;;  %v1265_v58 = vld [vmem:[%s1970_s1 + $0x350] sm:$0xff]  ;;  %v1266_v59 = vld [vmem:[%s1970_s1 + $0x358] sm:$0xff]  ;;  %v1264_v61 = vld [vmem:[%s1970_s1 + $0x348] sm:$0xff] }
  0x35   : > { %1185 = vmatmul.msk.f32.gmra.mxu2 %vm336_vm0, %v281_v13  ;;  %1189 = vmatmul.msk.f32.gmra.mxu3 %vm336_vm0, %v281_v13  ;;  %v1261_v62 = vld [vmem:[%s1970_s1 + $0x330] sm:$0xff]  ;;  %v1262_v63 = vld [vmem:[%s1970_s1 + $0x338] sm:$0xff]  ;;  %v1259_v2 = vld [vmem:[%s1970_s1 + $0x320] sm:$0xff] }
  0x36   : > { %528 = vmatpush.msrb.mxu0 %v1201_v14  ;;  %557 = vmatpush.msrb.mxu1 %v1202_v15  ;;  %v480_v0 = vld [vmem:[%s1519_s11 + $0x1a] sm:$0xf]  ;;  %v1260_v3 = vld [vmem:[%s1970_s1 + $0x328] sm:$0xff]  ;;  %v1257_v4 = vld [vmem:[%s1970_s1 + $0x310] sm:$0xff] }
  0x37   : > { %635 = vmatpush.msrb.mxu2 %v1233_v16  ;;  %664 = vmatpush.msrb.mxu3 %v1234_v17  ;;  %v587_v1 = vld [vmem:[%s1519_s11 + $0x1b] sm:$0xf]  ;;  %v1255_v6 = vld [vmem:[%s1970_s1 + $0x300] sm:$0xff]  ;;  %v1256_v7 = vld [vmem:[%s1970_s1 + $0x308] sm:$0xff] }
  0x38   : > { %529 = vmatpush.msrb.mxu0 %v1199_v18  ;;  %558 = vmatpush.msrb.mxu1 %v1200_v19  ;;  %v1258_v5 = vld [vmem:[%s1970_s1 + $0x318] sm:$0xff]  ;;  %v691_v8 = vld [vmem:[%s1519_s11 + $0x4] sm:$0xff]  ;;  %v692_v9 = vld [vmem:[%s1519_s11 + $0xc] sm:$0xff] }
  0x39   : > { %636 = vmatpush.msrb.mxu2 %v1231_v20  ;;  %665 = vmatpush.msrb.mxu3 %v1232_v21  ;;  %v693_v10 = vld [vmem:[%s1519_s11 + $0x14] sm:$0xff]  ;;  %v694_v11 = vld [vmem:[%s1519_s11 + $0x1c] sm:$0xf] }
  0x3a   : > { %530 = vmatpush.msrb.mxu0 %v1197_v22  ;;  %559 = vmatpush.msrb.mxu1 %v1198_v23 }
  0x3b   : > { %637 = vmatpush.msrb.mxu2 %v1229_v24  ;;  %666 = vmatpush.msrb.mxu3 %v1230_v25 }
  0x3c   : > { %1178 = vmatmul.msk.f32.gmra.mxu0 %vm336_vm0, %v310_v26  ;;  %1182 = vmatmul.msk.f32.gmra.mxu1 %vm336_vm0, %v310_v26 }
  0x3d   : > { %1186 = vmatmul.msk.f32.gmra.mxu2 %vm336_vm0, %v282_v27  ;;  %1190 = vmatmul.msk.f32.gmra.mxu3 %vm336_vm0, %v282_v27 }
  0x3e   : > { %531 = vmatpush.msrb.mxu0 %v1195_v28  ;;  %560 = vmatpush.msrb.mxu1 %v1196_v29 }
  0x3f   : > { %638 = vmatpush.msrb.mxu2 %v1227_v30  ;;  %667 = vmatpush.msrb.mxu3 %v1228_v31 }
  0x40   : > { %532 = vmatpush.msrb.mxu0 %v1193_v32  ;;  %561 = vmatpush.msrb.mxu1 %v1194_v33 }
  0x41   : > { %639 = vmatpush.msrb.mxu2 %v1225_v34  ;;  %668 = vmatpush.msrb.mxu3 %v1226_v35 }
  0x42   : > { %533 = vmatpush.msrb.mxu0 %v1191_v36  ;;  %562 = vmatpush.msrb.mxu1 %v1192_v37 }
  0x43   : > { %640 = vmatpush.msrb.mxu2 %v1223_v38  ;;  %669 = vmatpush.msrb.mxu3 %v1224_v39 }
  0x44   : > { %1215 = vmatmul.msk.f32.vlgmr.msrb.gmra.mxu0 %vm336_vm0, %v477_v40  ;;  %1219 = vmatmul.msk.f32.vlgmr.msrb.gmra.mxu1 %vm336_vm0, %v477_v40 }
  0x45   : > { %1247 = vmatmul.msk.f32.vlgmr.msrb.gmra.mxu2 %vm336_vm0, %v584_v41  ;;  %1251 = vmatmul.msk.f32.vlgmr.msrb.gmra.mxu3 %vm336_vm0, %v584_v41 }
  0x46   : > { %736 = vmatpush.msra.mxu0 %v1277_v42  ;;  %765 = vmatpush.msra.mxu1 %v1278_v43 }
  0x48   : > { %737 = vmatpush.msra.mxu0 %v1275_v44  ;;  %766 = vmatpush.msra.mxu1 %v1276_v45 }
  0x4a   : > { %738 = vmatpush.msra.mxu0 %v1273_v46  ;;  %767 = vmatpush.msra.mxu1 %v1274_v47 }
  0x4c   : > { %1216 = vmatmul.msk.f32.gmra.mxu0 %vm336_vm0, %v478_v48  ;;  %1220 = vmatmul.msk.f32.gmra.mxu1 %vm336_vm0, %v478_v48 }
  0x4d   : > { %1248 = vmatmul.msk.f32.gmra.mxu2 %vm336_vm0, %v585_v49  ;;  %1252 = vmatmul.msk.f32.gmra.mxu3 %vm336_vm0, %v585_v49 }
  0x4e   : > { %739 = vmatpush.msra.mxu0 %v1271_v50  ;;  %768 = vmatpush.msra.mxu1 %v1272_v51 }
  0x50   : > { %740 = vmatpush.msra.mxu0 %v1269_v52  ;;  %769 = vmatpush.msra.mxu1 %v1270_v53 }
  0x52   : > { %741 = vmatpush.msra.mxu0 %v1267_v54  ;;  %770 = vmatpush.msra.mxu1 %v1268_v55 }
  0x54   : > { %1217 = vmatmul.msk.f32.gmra.mxu0 %vm336_vm0, %v479_v56  ;;  %1221 = vmatmul.msk.f32.gmra.mxu1 %vm336_vm0, %v479_v56 }
  0x55   : > { %1249 = vmatmul.msk.f32.gmra.mxu2 %vm336_vm0, %v586_v57  ;;  %1253 = vmatmul.msk.f32.gmra.mxu3 %vm336_vm0, %v586_v57 }
  0x56   : > { %742 = vmatpush.msra.mxu0 %v1265_v58  ;;  %771 = vmatpush.msra.mxu1 %v1266_v59 }
  0x58   : > { %743 = vmatpush.msra.mxu0 %v1263_v60  ;;  %772 = vmatpush.msra.mxu1 %v1264_v61 }
  0x5a   : > { %744 = vmatpush.msra.mxu0 %v1261_v62  ;;  %773 = vmatpush.msra.mxu1 %v1262_v63 }
  0x5c   : > { %1218 = vmatmul.msk.f32.gmra.mxu0 %vm336_vm0, %v480_v0  ;;  %1222 = vmatmul.msk.f32.gmra.mxu1 %vm336_vm0, %v480_v0 }
  0x5d   : > { %1250 = vmatmul.msk.f32.gmra.mxu2 %vm336_vm0, %v587_v1  ;;  %1254 = vmatmul.msk.f32.gmra.mxu3 %vm336_vm0, %v587_v1 }
  0x5e   : > { %745 = vmatpush.msra.mxu0 %v1259_v2  ;;  %774 = vmatpush.msra.mxu1 %v1260_v3  ;;  %v798_v2 = vld [vmem:[%s1971_s2] sm:$0x3] }
  0x60   : > { %746 = vmatpush.msra.mxu0 %v1257_v4  ;;  %775 = vmatpush.msra.mxu1 %v1258_v5 }
  0x62   : > { %747 = vmatpush.msra.mxu0 %v1255_v6  ;;  %776 = vmatpush.msra.mxu1 %v1256_v7 }
  0x64   : > { %1279 = vmatmul.msk.f32.vlgmr.msra.gmra.mxu0 %vm336_vm0, %v691_v8  ;;  %1283 = vmatmul.msk.f32.vlgmr.msra.gmra.mxu1 %vm336_vm0, %v691_v8 }
  0x6c   : > { %1280 = vmatmul.msk.f32.gmra.mxu0 %vm336_vm0, %v692_v9  ;;  %1284 = vmatmul.msk.f32.gmra.mxu1 %vm336_vm0, %v692_v9 }
  0x74   : > { %1281 = vmatmul.msk.f32.gmra.mxu0 %vm336_vm0, %v693_v10  ;;  %1285 = vmatmul.msk.f32.gmra.mxu1 %vm336_vm0, %v693_v10 }
  0x7c   : > { %1282 = vmatmul.msk.f32.gmra.mxu0 %vm336_vm0, %v694_v11  ;;  %1286 = vmatmul.msk.f32.gmra.mxu1 %vm336_vm0, %v694_v11 }
  0xa1   : > { %v366_v12 = vpop.f32.mrf.mxu0  ;;  %v395_v13 = vpop.f32.mrf.mxu1 }
  0xa8   : > { %v436_v16 = vpop.f32.mrf.mxu2  ;;  %v465_v17 = vpop.f32.mrf.mxu3 }
  0xa9   : > { %v369_v14 = vpop.f32.mrf.mxu0  ;;  %v398_v15 = vpop.f32.mrf.mxu1  ;;  %v437_v56 = vadd.f32 %v436_v16, %v366_v12  ;;  %v466_v57 = vadd.f32 %v465_v17, %v395_v13  ;;  %v800_v13 = vperm.slane %v798_v2, 0 }
  0xb0   : > { %v439_v20 = vpop.f32.mrf.mxu2  ;;  %v468_v21 = vpop.f32.mrf.mxu3 }
  0xb1   : > { %v372_v18 = vpop.f32.mrf.mxu0  ;;  %v401_v19 = vpop.f32.mrf.mxu1  ;;  %v440_v50 = vadd.f32 %v439_v20, %v369_v14  ;;  %v469_v51 = vadd.f32 %v468_v21, %v398_v15  ;;  %v801_v14 = vperm.slane %v798_v2, 1  ;;  %v1034_v2 = vld [vmem:[%s1975_s6 + $0xa0] sm:$0xff] }
  0xb8   : > { %v442_v26 = vpop.f32.mrf.mxu2  ;;  %v471_v27 = vpop.f32.mrf.mxu3 }
  0xb9   : > { %v375_v22 = vpop.f32.mrf.mxu0  ;;  %v404_v23 = vpop.f32.mrf.mxu1  ;;  %v443_v48 = vadd.f32 %v442_v26, %v372_v18  ;;  %v472_v49 = vadd.f32 %v471_v27, %v401_v19 }
  0xc0   : > { %v445_v30 = vpop.f32.mrf.mxu2  ;;  %v474_v31 = vpop.f32.mrf.mxu3 }
  0xc1   : > { %v535_v24 = vpop.f32.mrf.mxu0  ;;  %v564_v25 = vpop.f32.mrf.mxu1  ;;  %v446_v52 = vadd.f32 %v445_v30, %v375_v22  ;;  %v475_v53 = vadd.f32 %v474_v31, %v404_v23 }
  0xc2   : > { %v576_v3 = vadd.f32 %v535_v24, %v437_v56  ;;  %v577_v4 = vadd.f32 %v564_v25, %v466_v57  ;;  %v949_v56 = vld [vmem:[%s1974_s5 + $0x48] sm:$0xff]  ;;  %v1022_v57 = vld [vmem:[%s1975_s6 + $0x40] sm:$0xff] }
  0xc8   : > { %v642_v34 = vpop.f32.mrf.mxu2  ;;  %v671_v35 = vpop.f32.mrf.mxu3 }
  0xc9   : > { %v538_v28 = vpop.f32.mrf.mxu0  ;;  %v567_v29 = vpop.f32.mrf.mxu1  ;;  %v683_v11 = vadd.f32 %v642_v34, %v576_v3  ;;  %v684_v12 = vadd.f32 %v671_v35, %v577_v4  ;;  %v955_v35 = vld [vmem:[%s1974_s5 + $0x78] sm:$0xff] }
  0xca   : > { %v578_v58 = vadd.f32 %v538_v28, %v440_v50  ;;  %v579_v59 = vadd.f32 %v567_v29, %v469_v51  ;;  %968 = vmatpush.msrb.mxu0 %v955_v35  ;;  %v1024_v50 = vld [vmem:[%s1975_s6 + $0x50] sm:$0xff]  ;;  %v883_v51 = vld [vmem:[%s1973_s4 + $0x8] sm:$0x3f]  ;;  %v1017_v3 = vld [vmem:[%s1975_s6 + $0x18] sm:$0xff] }
  0xcb   : > { %v1033_v4 = vld [vmem:[%s1975_s6 + $0x98] sm:$0xff] }
  0xd0   : > { %v645_v38 = vpop.f32.mrf.mxu2  ;;  %v674_v39 = vpop.f32.mrf.mxu3 }
  0xd1   : > { %v541_v32 = vpop.f32.mrf.mxu0  ;;  %v570_v33 = vpop.f32.mrf.mxu1  ;;  %v685_v5 = vadd.f32 %v645_v38, %v578_v58  ;;  %v686_v6 = vadd.f32 %v674_v39, %v579_v59  ;;  %v954_v38 = vld [vmem:[%s1974_s5 + $0x70] sm:$0xff]  ;;  %v1021_v58 = vld [vmem:[%s1975_s6 + $0x38] sm:$0xff]  ;;  %v948_v59 = vld [vmem:[%s1974_s5 + $0x40] sm:$0xff] }
  0xd2   : > { %v580_v54 = vadd.f32 %v541_v32, %v443_v48  ;;  %v581_v55 = vadd.f32 %v570_v33, %v472_v49  ;;  %969 = vmatpush.msrb.mxu0 %v954_v38  ;;  %v1025_v48 = vld [vmem:[%s1975_s6 + $0x58] sm:$0xff]  ;;  %v882_v49 = vld [vmem:[%s1973_s4] sm:$0xff] }
  0xd8   : > { %v648_v44 = vpop.f32.mrf.mxu2  ;;  %v677_v45 = vpop.f32.mrf.mxu3 }
  0xd9   : > { %v544_v36 = vpop.f32.mrf.mxu0  ;;  %v573_v37 = vpop.f32.mrf.mxu1  ;;  %v687_v62 = vadd.f32 %v648_v44, %v580_v54  ;;  %v688_v63 = vadd.f32 %v677_v45, %v581_v55  ;;  %v821_v44 = vld [vmem:[%s1972_s3 + $0x8] sm:$0x3f]  ;;  %v1028_v45 = vld [vmem:[%s1975_s6 + $0x70] sm:$0xff] }
  0xda   : > { %v582_v0 = vadd.f32 %v544_v36, %v446_v52  ;;  %v583_v1 = vadd.f32 %v573_v37, %v475_v53  ;;  %v952_v52 = vld [vmem:[%s1974_s5 + $0x60] sm:$0xff]  ;;  %v951_v53 = vld [vmem:[%s1974_s5 + $0x58] sm:$0xff]  ;;  %v950_v54 = vld [vmem:[%s1974_s5 + $0x50] sm:$0xff] }
  0xdb   : > { %v1023_v55 = vld [vmem:[%s1975_s6 + $0x48] sm:$0xff] }
  0xe0   : > { %v651_v60 = vpop.f32.mrf.mxu2  ;;  %v680_v61 = vpop.f32.mrf.mxu3 }
  0xe1   : > { %v749_v40 = vpop.f32.mrf.mxu0  ;;  %v778_v41 = vpop.f32.mrf.mxu1  ;;  %v689_v7 = vadd.f32 %v651_v60, %v582_v0  ;;  %v690_v8 = vadd.f32 %v680_v61, %v583_v1  ;;  %v1020_v60 = vld [vmem:[%s1975_s6 + $0x30] sm:$0xff]  ;;  %v947_v61 = vld [vmem:[%s1974_s5 + $0x38] sm:$0xff]  ;;  %v945_v0 = vld [vmem:[%s1974_s5 + $0x28] sm:$0xff] }
  0xe2   : > { %v790_v21 = vadd.f32 %v749_v40, %v683_v11  ;;  %v791_v22 = vadd.f32 %v778_v41, %v684_v12  ;;  %v820_v41 = vld [vmem:[%s1972_s3] sm:$0xff]  ;;  %v958_v11 = vld [vmem:[%s1974_s5 + $0x90] sm:$0xff] }
  0xe3   : > { %v1018_v1 = vld [vmem:[%s1975_s6 + $0x20] sm:$0xff]  ;;  %v942_v12 = vld [vmem:[%s1974_s5 + $0x10] sm:$0xff] }
  0xe4   : > { %v804_v31 = vadd.f32 %v800_v13, %v790_v21  ;;  %v805_v32 = vadd.f32 %v801_v14, %v791_v22 }
  0xe6   : > { %v812_v39 = vmax.f32 %v804_v31, 0.0  ;;  %v813_v40 = vmax.f32 %v805_v32, 0.0 }
  0xe9   : > { %v752_v42 = vpop.f32.mrf.mxu0  ;;  %v781_v43 = vpop.f32.mrf.mxu1 }
  0xea   : > { %v792_v17 = vadd.f32 %v752_v42, %v685_v5  ;;  %v793_v18 = vadd.f32 %v781_v43, %v686_v6  ;;  %v953_v42 = vld [vmem:[%s1974_s5 + $0x68] sm:$0xff]  ;;  %v1029_v43 = vld [vmem:[%s1975_s6 + $0x78] sm:$0xff]  ;;  %v1032_v5 = vld [vmem:[%s1975_s6 + $0x90] sm:$0xff] }
  0xeb   : > { %970 = vmatpush.msrb.mxu0 %v953_v42  ;;  %v960_v6 = vld [vmem:[%s1974_s5 + $0xa0] sm:$0xff] }
  0xec   : > { %v806_v27 = vadd.f32 %v800_v13, %v792_v17  ;;  %v807_v28 = vadd.f32 %v801_v14, %v793_v18  ;;  %1002 = vmatpush.msrb.mxu1 %v960_v6  ;;  %v1014_v17 = vld [vmem:[%s1975_s6] sm:$0xff] }
  0xed   : > { %971 = vmatpush.msrb.mxu0 %v952_v52  ;;  %v1030_v18 = vld [vmem:[%s1975_s6 + $0x80] sm:$0xff] }
  0xee   : > { %v814_v36 = vmax.f32 %v806_v27, 0.0  ;;  %v815_v37 = vmax.f32 %v807_v28, 0.0 }
  0xef   : > { %972 = vmatpush.msrb.mxu0 %v951_v53 }
  0xf1   : > { %v755_v46 = vpop.f32.mrf.mxu0  ;;  %v784_v47 = vpop.f32.mrf.mxu1  ;;  %973 = vmatpush.msrb.mxu0 %v950_v54 }
  0xf2   : > { %v794_v9 = vadd.f32 %v755_v46, %v687_v62  ;;  %v795_v10 = vadd.f32 %v784_v47, %v688_v63  ;;  %v1027_v46 = vld [vmem:[%s1975_s6 + $0x68] sm:$0xff]  ;;  %v1026_v47 = vld [vmem:[%s1975_s6 + $0x60] sm:$0xff]  ;;  %v946_v62 = vld [vmem:[%s1974_s5 + $0x30] sm:$0xff] }
  0xf3   : > { %974 = vmatpush.msrb.mxu0 %v949_v56  ;;  %v1019_v63 = vld [vmem:[%s1975_s6 + $0x28] sm:$0xff] }
  0xf4   : > { %v808_v23 = vadd.f32 %v800_v13, %v794_v9  ;;  %v809_v24 = vadd.f32 %v801_v14, %v795_v10  ;;  %v943_v9 = vld [vmem:[%s1974_s5 + $0x18] sm:$0xff] }
  0xf5   : > { %975 = vmatpush.msrb.mxu0 %v948_v59  ;;  %v959_v10 = vld [vmem:[%s1974_s5 + $0x98] sm:$0xff] }
  0xf6   : > { %v816_v33 = vmax.f32 %v808_v23, 0.0  ;;  %v817_v34 = vmax.f32 %v809_v24, 0.0  ;;  %1003 = vmatpush.msrb.mxu1 %v959_v10 }
  0xf7   : > { %976 = vmatpush.msrb.mxu0 %v947_v61 }
  0xf8   : > { %1004 = vmatpush.msrb.mxu1 %v958_v11 }
  0xf9   : > { %v758_v15 = vpop.f32.mrf.mxu0  ;;  %v787_v16 = vpop.f32.mrf.mxu1  ;;  %977 = vmatpush.msrb.mxu0 %v946_v62 }
  0xfa   : > { %v796_v19 = vadd.f32 %v758_v15, %v689_v7  ;;  %v797_v20 = vadd.f32 %v787_v16, %v690_v8  ;;  %v944_v7 = vld [vmem:[%s1974_s5 + $0x20] sm:$0xff]  ;;  %v1016_v8 = vld [vmem:[%s1975_s6 + $0x10] sm:$0xff]  ;;  %v941_v15 = vld [vmem:[%s1974_s5 + $0x8] sm:$0xff] }
  0xfb   : > { %978 = vmatpush.msrb.mxu0 %v945_v0  ;;  %v957_v16 = vld [vmem:[%s1974_s5 + $0x88] sm:$0xff] }
  0xfc   : > { %v810_v25 = vadd.f32 %v800_v13, %v796_v19  ;;  %v811_v26 = vadd.f32 %v801_v14, %v797_v20  ;;  %v1015_v13 = vld [vmem:[%s1975_s6 + $0x8] sm:$0xff]  ;;  %1005 = vmatpush.msrb.mxu1 %v957_v16  ;;  %v940_v19 = vld [vmem:[%s1974_s5] sm:$0xff] }
  0xfd   : > { %979 = vmatpush.msrb.mxu0 %v944_v7  ;;  %v1031_v14 = vld [vmem:[%s1975_s6 + $0x88] sm:$0xff]  ;;  %v956_v20 = vld [vmem:[%s1974_s5 + $0x80] sm:$0xff] }
  0xfe   : > { %v818_v29 = vmax.f32 %v810_v25, 0.0  ;;  %v819_v30 = vmax.f32 %v811_v26, 0.0  ;;  %1006 = vmatpush.msrb.mxu1 %v956_v20 }
  0xff   : > { %980 = vmatpush.msrb.mxu0 %v943_v9 }
 0x100   : > { %1287 = vmatpush.msk.msra.mxu2 %vm829_vm1, %v818_v29  ;;  %1290 = vmatpush.msk.msra.mxu3 %vm829_vm1, %v819_v30 }
 0x101   : > { %981 = vmatpush.msrb.mxu0 %v942_v12 }
 0x102   : > { %849 = vmatpush.msra.mxu2 %v816_v33  ;;  %872 = vmatpush.msra.mxu3 %v817_v34 }
 0x103   : > { %982 = vmatpush.msrb.mxu0 %v941_v15 }
 0x104   : > { %850 = vmatpush.msra.mxu2 %v814_v36  ;;  %873 = vmatpush.msra.mxu3 %v815_v37 }
 0x105   : > { %983 = vmatpush.msrb.mxu0 %v940_v19 }
 0x106   : > { %851 = vmatpush.msra.mxu2 %v812_v39  ;;  %874 = vmatpush.msra.mxu3 %v813_v40 }
 0x107   : > { %1288 = vmatmul.msk.f32.vlgmr.msra.gmra.mxu2 %vm822_vm2, %v820_v41  ;;  %1291 = vmatmul.msk.f32.vlgmr.msra.gmra.mxu3 %vm822_vm2, %v820_v41 }
 0x108   : > { %1293 = vmatpush.msk.msrb.mxu2 %vm829_vm1, %v818_v29  ;;  %1296 = vmatpush.msk.msrb.mxu3 %vm829_vm1, %v819_v30 }
 0x10a   : > { %903 = vmatpush.msrb.mxu2 %v816_v33  ;;  %926 = vmatpush.msrb.mxu3 %v817_v34 }
 0x10c   : > { %904 = vmatpush.msrb.mxu2 %v814_v36  ;;  %927 = vmatpush.msrb.mxu3 %v815_v37 }
 0x10e   : > { %905 = vmatpush.msrb.mxu2 %v812_v39  ;;  %928 = vmatpush.msrb.mxu3 %v813_v40 }
 0x10f   : > { %1289 = vmatmul.msk.f32.gmra.mxu2 %vm822_vm2, %v821_v44  ;;  %1292 = vmatmul.msk.f32.gmra.mxu3 %vm822_vm2, %v821_v44 }
 0x110   : > { %1035 = vmatpush.msra.mxu2 %v1029_v43  ;;  %1069 = vmatpush.msra.mxu3 %v1034_v2 }
 0x112   : > { %1036 = vmatpush.msra.mxu2 %v1028_v45  ;;  %1070 = vmatpush.msra.mxu3 %v1033_v4 }
 0x114   : > { %1037 = vmatpush.msra.mxu2 %v1027_v46  ;;  %1071 = vmatpush.msra.mxu3 %v1032_v5 }
 0x116   : > { %1038 = vmatpush.msra.mxu2 %v1026_v47  ;;  %1072 = vmatpush.msra.mxu3 %v1031_v14 }
 0x117   : > { %1294 = vmatmul.msk.f32.vlgmr.msrb.gmra.mxu2 %vm822_vm2, %v882_v49  ;;  %1297 = vmatmul.msk.f32.vlgmr.msrb.gmra.mxu3 %vm822_vm2, %v882_v49 }
 0x118   : > { %1039 = vmatpush.msra.mxu2 %v1025_v48  ;;  %1073 = vmatpush.msra.mxu3 %v1030_v18 }
 0x11a   : > { %1040 = vmatpush.msra.mxu2 %v1024_v50 }
 0x11c   : > { %1041 = vmatpush.msra.mxu2 %v1023_v55 }
 0x11e   : > { %1042 = vmatpush.msra.mxu2 %v1022_v57 }
 0x11f   : > { %1295 = vmatmul.msk.f32.gmra.mxu2 %vm822_vm2, %v883_v51  ;;  %1298 = vmatmul.msk.f32.gmra.mxu3 %vm822_vm2, %v883_v51 }
 0x120   : > { %1043 = vmatpush.msra.mxu2 %v1021_v58 }
 0x122   : > { %1044 = vmatpush.msra.mxu2 %v1020_v60 }
 0x124   : > { %1045 = vmatpush.msra.mxu2 %v1019_v63 }
 0x126   : > { %1046 = vmatpush.msra.mxu2 %v1018_v1 }
 0x128   : > { %1047 = vmatpush.msra.mxu2 %v1017_v3 }
 0x12a   : > { %1048 = vmatpush.msra.mxu2 %v1016_v8 }
 0x12c   : > { %1049 = vmatpush.msra.mxu2 %v1015_v13 }
 0x12e   : > { %1050 = vmatpush.msra.mxu2 %v1014_v17 }
 0x18a   : > { %v853_v21 = vpop.f32.mrf.mxu2  ;;  %v876_v22 = vpop.f32.mrf.mxu3 }
 0x192   : > { %v856_v23 = vpop.f32.mrf.mxu2  ;;  %v879_v24 = vpop.f32.mrf.mxu3 }
 0x19a   : > { %v907_v25 = vpop.f32.mrf.mxu2  ;;  %v930_v26 = vpop.f32.mrf.mxu3 }
 0x19b   : > { %v936_v27 = vmax.f32 %v853_v21, %v907_v25  ;;  %v937_v28 = vmax.f32 %v876_v22, %v930_v26 }
 0x19d   : > { %1051 = vmatmul.f32.vlgmr.msra.gmra.mxu2 %v936_v27  ;;  %1301 = vmatmul.msk.f32.vlgmr.msra.gmra.mxu3 %vm961_vm3, %v937_v28 }
 0x19e   : > { %984 = vmatmul.f32.vlgmr.msrb.gmra.mxu0 %v936_v27  ;;  %1299 = vmatmul.msk.f32.vlgmr.msrb.gmra.mxu1 %vm961_vm3, %v937_v28 }
 0x1a2   : > { %v910_v29 = vpop.f32.mrf.mxu2  ;;  %v933_v30 = vpop.f32.mrf.mxu3 }
 0x1a3   : > { %v938_v31 = vmax.f32 %v856_v23, %v910_v29  ;;  %v939_v32 = vmax.f32 %v879_v24, %v933_v30 }
 0x1a5   : > { %1054 = vmatmul.f32.gmra.mxu2 %v938_v31  ;;  %1302 = vmatmul.msk.f32.gmra.mxu3 %vm961_vm3, %v939_v32 }
 0x1a6   : > { %987 = vmatmul.f32.gmra.mxu0 %v938_v31  ;;  %1300 = vmatmul.msk.f32.gmra.mxu1 %vm961_vm3, %v939_v32 }
 0x21b   : > { %v985_v33 = vpop.f32.mrf.mxu0  ;;  %v1008_v34 = vpop.f32.mrf.mxu1 }
 0x21c   : > { %v1009_v37 = vadd.f32 %v1008_v34, %v985_v33 }
 0x220   : > { %v1052_v35 = vpop.f32.mrf.mxu2  ;;  %v1075_v36 = vpop.f32.mrf.mxu3 }
 0x221   : > { %v1076_v38 = vadd.f32 %v1075_v36, %v1052_v35 }
 0x223   : > { %v1081_v39 = vmax.f32 %v1009_v37, %v1076_v38  ;;  %v988_v40 = vpop.f32.mrf.mxu0  ;;  %v1011_v41 = vpop.f32.mrf.mxu1 }
 0x224   : > { %v1012_v44 = vadd.f32 %v1011_v41, %v988_v40 }
 0x225   : > { %1084 = vst.msk [vmem:[%s278_s16] sm:$0xff] %vm1083_vm4, %v1081_v39 }
 0x228   : > { %v1055_v42 = vpop.f32.mrf.mxu2  ;;  %v1078_v43 = vpop.f32.mrf.mxu3 }
 0x229   : > { %v1079_v45 = vadd.f32 %v1078_v43, %v1055_v42 }
 0x22b   : > { %v1082_v46 = vmax.f32 %v1012_v44, %v1079_v45 }
 0x22d   : > { %1086 = vst.msk [vmem:[%s278_s16 + $0x8] sm:$0x3f] %vm1085_vm5, %v1082_v46 }
 0x22e PF: > { %s17_s24 = sadd.s32 1, %s1321_s24  }
 0x22f   : > { %p14_p4 = scmp.ge.s32.totalorder %s17_s24, 4  }
 0x231   :  { %16 = sbr.rel (!%p14_p4) target bundleno = 1 (0x1), region = 82 }

// kernel: lenet_forward.5
= control target key start
LH: loop header
LB: loop body
LE: loop exit
PB: predicated region body
PF: predicated region fallthrough
CT: control target
= control target key end

     0   :  { %vm84_vm0 = vcmask 130048   ;;  %vm230_vm1 = vcmask 1043456   ;;  %vm187_vm2 = vcmask 982016   ;;  %vm226_vm3 = vcmask 687104   ;;  %s558_s1 = inlined_call_operand.vmem [shape: f32[400,120], index: 1, kind: input, shape index: {}]   ;;  %s559_s0 = inlined_call_operand.vmem [shape: f32[8,400], index: 0, kind: input, shape index: {}]   ;;  %s560_s3 = inlined_call_operand.vmem [shape: f32[120,84], index: 3, kind: input, shape index: {}]   ;;  %s561_s2 = inlined_call_operand.vmem [shape: f32[1,120], index: 2, kind: input, shape index: {}]   ;;  %s562_s4 = inlined_call_operand.vmem [shape: f32[1,84], index: 4, kind: input, shape index: {}]   ;;  %s563_s5 = inlined_call_operand.vmem [shape: f32[84,128], index: 5, kind: input, shape index: {}]   ;;  %s564_s6 = inlined_call_operand.vmem [shape: f32[1,128], index: 6, kind: input, shape index: {}]   ;;  %s565_s7 = inlined_call_operand.vmem [shape: f32[8,128], index: 7, kind: output, shape index: {}]  }
   0x1   :  { %v77_v0 = vld [vmem:[%s558_s1 + $0x178] sm:$0xff]  ;;  %v76_v2 = vld [vmem:[%s558_s1 + $0x170] sm:$0xff]  ;;  %v75_v5 = vld [vmem:[%s558_s1 + $0x168] sm:$0xff] }
   0x2   :  { %v45_v1 = vld [vmem:[%s558_s1 + $0x78] sm:$0xff]  ;;  %128 = vmatpush.msra.mxu2 %v77_v0  ;;  %v44_v3 = vld [vmem:[%s558_s1 + $0x70] sm:$0xff]  ;;  %v43_v6 = vld [vmem:[%s558_s1 + $0x68] sm:$0xff] }
   0x3   :  { %88 = vmatpush.msra.mxu0 %v45_v1  ;;  %v61_v4 = vld [vmem:[%s558_s1 + $0xf8] sm:$0xff]  ;;  %v60_v7 = vld [vmem:[%s558_s1 + $0xf0] sm:$0xff]  ;;  %v59_v8 = vld [vmem:[%s558_s1 + $0xe8] sm:$0xff] }
   0x4   :  { %108 = vmatpush.msra.mxu1 %v61_v4  ;;  %129 = vmatpush.msra.mxu2 %v76_v2  ;;  %v74_v9 = vld [vmem:[%s558_s1 + $0x160] sm:$0xff]  ;;  %v73_v12 = vld [vmem:[%s558_s1 + $0x158] sm:$0xff]  ;;  %v72_v15 = vld [vmem:[%s558_s1 + $0x150] sm:$0xff] }
   0x5   :  { %89 = vmatpush.msra.mxu0 %v44_v3  ;;  %v42_v10 = vld [vmem:[%s558_s1 + $0x60] sm:$0xff]  ;;  %v41_v13 = vld [vmem:[%s558_s1 + $0x58] sm:$0xff]  ;;  %v40_v16 = vld [vmem:[%s558_s1 + $0x50] sm:$0xff] }
   0x6   :  { %109 = vmatpush.msra.mxu1 %v60_v7  ;;  %130 = vmatpush.msra.mxu2 %v75_v5  ;;  %v58_v11 = vld [vmem:[%s558_s1 + $0xe0] sm:$0xff]  ;;  %v57_v14 = vld [vmem:[%s558_s1 + $0xd8] sm:$0xff]  ;;  %v56_v17 = vld [vmem:[%s558_s1 + $0xd0] sm:$0xff] }
   0x7   :  { %90 = vmatpush.msra.mxu0 %v43_v6  ;;  %v71_v18 = vld [vmem:[%s558_s1 + $0x148] sm:$0xff]  ;;  %v70_v21 = vld [vmem:[%s558_s1 + $0x140] sm:$0xff]  ;;  %v69_v24 = vld [vmem:[%s558_s1 + $0x138] sm:$0xff] }
   0x8   :  { %110 = vmatpush.msra.mxu1 %v59_v8  ;;  %131 = vmatpush.msra.mxu2 %v74_v9  ;;  %v39_v19 = vld [vmem:[%s558_s1 + $0x48] sm:$0xff]  ;;  %v38_v22 = vld [vmem:[%s558_s1 + $0x40] sm:$0xff]  ;;  %v37_v25 = vld [vmem:[%s558_s1 + $0x38] sm:$0xff] }
   0x9   :  { %91 = vmatpush.msra.mxu0 %v42_v10  ;;  %v55_v20 = vld [vmem:[%s558_s1 + $0xc8] sm:$0xff]  ;;  %v54_v23 = vld [vmem:[%s558_s1 + $0xc0] sm:$0xff]  ;;  %v53_v26 = vld [vmem:[%s558_s1 + $0xb8] sm:$0xff] }
   0xa   :  { %111 = vmatpush.msra.mxu1 %v58_v11  ;;  %132 = vmatpush.msra.mxu2 %v73_v12  ;;  %v79_v27 = vld [vmem:[%s558_s1 + $0x188] sm:$0xff]  ;;  %v68_v28 = vld [vmem:[%s558_s1 + $0x130] sm:$0xff]  ;;  %v78_v30 = vld [vmem:[%s558_s1 + $0x180] sm:$0xff] }
   0xb   :  { %92 = vmatpush.msra.mxu0 %v41_v13  ;;  %v36_v29 = vld [vmem:[%s558_s1 + $0x30] sm:$0xff]  ;;  %162 = vmatpush.msra.mxu3 %v79_v27  ;;  %v29_v32 = vld [vmem:[%s559_s0 + $0x18] sm:$0xff]  ;;  %v67_v33 = vld [vmem:[%s558_s1 + $0x128] sm:$0xff] }
   0xc   :  { %112 = vmatpush.msra.mxu1 %v57_v14  ;;  %133 = vmatpush.msra.mxu2 %v72_v15  ;;  %v52_v31 = vld [vmem:[%s558_s1 + $0xb0] sm:$0xff]  ;;  %v35_v34 = vld [vmem:[%s558_s1 + $0x28] sm:$0xff]  ;;  %v66_v37 = vld [vmem:[%s558_s1 + $0x120] sm:$0xff] }
   0xd   :  { %93 = vmatpush.msra.mxu0 %v40_v16  ;;  %163 = vmatpush.msra.mxu3 %v78_v30  ;;  %v51_v35 = vld [vmem:[%s558_s1 + $0xa8] sm:$0xff]  ;;  %v182_v36 = vld [vmem:[%s560_s3 + $0x70] sm:$0xff]  ;;  %v34_v38 = vld [vmem:[%s558_s1 + $0x20] sm:$0xff] }
   0xe   :  { %113 = vmatpush.msra.mxu1 %v56_v17  ;;  %134 = vmatpush.msra.mxu2 %v71_v18  ;;  %v50_v39 = vld [vmem:[%s558_s1 + $0xa0] sm:$0xff]  ;;  %v181_v40 = vld [vmem:[%s560_s3 + $0x68] sm:$0xff]  ;;  %v65_v41 = vld [vmem:[%s558_s1 + $0x118] sm:$0xff] }
   0xf   :  { %94 = vmatpush.msra.mxu0 %v39_v19  ;;  %259 = vmatmul.msk.f32.vlgmr.msra.gmra.mxu3 %vm84_vm0, %v29_v32  ;;  %v33_v42 = vld [vmem:[%s558_s1 + $0x18] sm:$0xff]  ;;  %v180_v44 = vld [vmem:[%s560_s3 + $0x60] sm:$0xff]  ;;  %v64_v45 = vld [vmem:[%s558_s1 + $0x110] sm:$0xff] }
  0x10   :  { %114 = vmatpush.msra.mxu1 %v55_v20  ;;  %135 = vmatpush.msra.mxu2 %v70_v21  ;;  %v49_v43 = vld [vmem:[%s558_s1 + $0x98] sm:$0xff]  ;;  %v32_v46 = vld [vmem:[%s558_s1 + $0x10] sm:$0xff]  ;;  %v63_v49 = vld [vmem:[%s558_s1 + $0x108] sm:$0xff] }
  0x11   :  { %95 = vmatpush.msra.mxu0 %v38_v22  ;;  %192 = vmatpush.msrb.mxu3 %v182_v36  ;;  %v48_v47 = vld [vmem:[%s558_s1 + $0x90] sm:$0xff]  ;;  %v179_v48 = vld [vmem:[%s560_s3 + $0x58] sm:$0xff]  ;;  %v31_v50 = vld [vmem:[%s558_s1 + $0x8] sm:$0xff] }
  0x12   :  { %115 = vmatpush.msra.mxu1 %v54_v23  ;;  %136 = vmatpush.msra.mxu2 %v69_v24  ;;  %v47_v51 = vld [vmem:[%s558_s1 + $0x88] sm:$0xff]  ;;  %v178_v52 = vld [vmem:[%s560_s3 + $0x50] sm:$0xff]  ;;  %v62_v53 = vld [vmem:[%s558_s1 + $0x100] sm:$0xff] }
  0x13   :  { %96 = vmatpush.msra.mxu0 %v37_v25  ;;  %193 = vmatpush.msrb.mxu3 %v181_v40  ;;  %v30_v54 = vld [vmem:[%s558_s1] sm:$0xff]  ;;  %v28_v55 = vld [vmem:[%s559_s0 + $0x10] sm:$0xff]  ;;  %v177_v58 = vld [vmem:[%s560_s3 + $0x48] sm:$0xff] }
  0x14   :  { %116 = vmatpush.msra.mxu1 %v53_v26  ;;  %137 = vmatpush.msra.mxu2 %v68_v28  ;;  %v26_v56 = vld [vmem:[%s559_s0] sm:$0xff]  ;;  %v27_v59 = vld [vmem:[%s559_s0 + $0x8] sm:$0xff]  ;;  %v175_v61 = vld [vmem:[%s560_s3 + $0x38] sm:$0xff] }
  0x15   :  { %97 = vmatpush.msra.mxu0 %v36_v29  ;;  %194 = vmatpush.msrb.mxu3 %v180_v44  ;;  %v46_v57 = vld [vmem:[%s558_s1 + $0x80] sm:$0xff]  ;;  %v174_v62 = vld [vmem:[%s560_s3 + $0x30] sm:$0xff]  ;;  %v173_v63 = vld [vmem:[%s560_s3 + $0x28] sm:$0xff] }
  0x16   :  { %117 = vmatpush.msra.mxu1 %v52_v31  ;;  %138 = vmatpush.msra.mxu2 %v67_v33  ;;  %v176_v60 = vld [vmem:[%s560_s3 + $0x40] sm:$0xff]  ;;  %v171_v1 = vld [vmem:[%s560_s3 + $0x18] sm:$0xff]  ;;  %v170_v2 = vld [vmem:[%s560_s3 + $0x10] sm:$0xff] }
  0x17   :  { %98 = vmatpush.msra.mxu0 %v35_v34  ;;  %195 = vmatpush.msrb.mxu3 %v179_v48  ;;  %v172_v0 = vld [vmem:[%s560_s3 + $0x20] sm:$0xff]  ;;  %v169_v3 = vld [vmem:[%s560_s3 + $0x8] sm:$0xff]  ;;  %v221_v5 = vld [vmem:[%s563_s5 + $0x50] sm:$0xf] }
  0x18   :  { %118 = vmatpush.msra.mxu1 %v51_v35  ;;  %139 = vmatpush.msra.mxu2 %v66_v37  ;;  %v168_v4 = vld [vmem:[%s560_s3] sm:$0xff]  ;;  %v220_v6 = vld [vmem:[%s563_s5 + $0x48] sm:$0xff]  ;;  %v218_v8 = vld [vmem:[%s563_s5 + $0x38] sm:$0xff] }
  0x19   :  { %99 = vmatpush.msra.mxu0 %v34_v38  ;;  %196 = vmatpush.msrb.mxu3 %v178_v52  ;;  %v219_v7 = vld [vmem:[%s563_s5 + $0x40] sm:$0xff]  ;;  %v217_v9 = vld [vmem:[%s563_s5 + $0x30] sm:$0xff]  ;;  %v216_v10 = vld [vmem:[%s563_s5 + $0x28] sm:$0xff] }
  0x1a   :  { %119 = vmatpush.msra.mxu1 %v50_v39  ;;  %140 = vmatpush.msra.mxu2 %v65_v41  ;;  %v215_v11 = vld [vmem:[%s563_s5 + $0x20] sm:$0xff]  ;;  %v214_v12 = vld [vmem:[%s563_s5 + $0x18] sm:$0xff]  ;;  %v213_v13 = vld [vmem:[%s563_s5 + $0x10] sm:$0xff] }
  0x1b   :  { %100 = vmatpush.msra.mxu0 %v33_v42  ;;  %197 = vmatpush.msrb.mxu3 %v177_v58  ;;  %v263_v14 = vld [vmem:[%s561_s2] ss:$0 sm:$0xff]  ;;  %v212_v23 = vld [vmem:[%s563_s5 + $0x8] sm:$0xff] }
  0x1c   :  { %120 = vmatpush.msra.mxu1 %v49_v43  ;;  %141 = vmatpush.msra.mxu2 %v64_v45  ;;  %v211_v24 = vld [vmem:[%s563_s5] sm:$0xff] }
  0x1d   :  { %101 = vmatpush.msra.mxu0 %v32_v46  ;;  %198 = vmatpush.msrb.mxu3 %v176_v60  ;;  %v264_v25 = vld [vmem:[%s562_s4] ss:$0 sm:$0xff] }
  0x1e   :  { %121 = vmatpush.msra.mxu1 %v48_v47  ;;  %142 = vmatpush.msra.mxu2 %v63_v49  ;;  %v265_v28 = vld [vmem:[%s564_s6] ss:$0 sm:$0xff] }
  0x1f   :  { %102 = vmatpush.msra.mxu0 %v31_v50  ;;  %199 = vmatpush.msrb.mxu3 %v175_v61 }
  0x20   :  { %122 = vmatpush.msra.mxu1 %v47_v51  ;;  %143 = vmatpush.msra.mxu2 %v62_v53 }
  0x21   :  { %103 = vmatpush.msra.mxu0 %v30_v54  ;;  %144 = vmatmul.f32.vlgmr.msra.gmra.mxu2 %v28_v55 }
  0x22   :  { %104 = vmatmul.f32.vlgmr.msra.gmra.mxu0 %v26_v56  ;;  %123 = vmatpush.msra.mxu1 %v46_v57 }
  0x23   :  { %124 = vmatmul.f32.vlgmr.msra.gmra.mxu1 %v27_v59  ;;  %200 = vmatpush.msrb.mxu3 %v174_v62 }
  0x24   :  { %261 = vmatpush.msk.msrb.mxu0 %vm230_vm1, %v221_v5 }
  0x25   :  { %201 = vmatpush.msrb.mxu3 %v173_v63 }
  0x26   :  { %240 = vmatpush.msrb.mxu0 %v220_v6 }
  0x27   :  { %202 = vmatpush.msrb.mxu3 %v172_v0 }
  0x28   :  { %241 = vmatpush.msrb.mxu0 %v219_v7 }
  0x29   :  { %203 = vmatpush.msrb.mxu3 %v171_v1 }
  0x2a   :  { %242 = vmatpush.msrb.mxu0 %v218_v8 }
  0x2b   :  { %204 = vmatpush.msrb.mxu3 %v170_v2 }
  0x2c   :  { %243 = vmatpush.msrb.mxu0 %v217_v9 }
  0x2d   :  { %205 = vmatpush.msrb.mxu3 %v169_v3 }
  0x2e   :  { %244 = vmatpush.msrb.mxu0 %v216_v10 }
  0x2f   :  { %206 = vmatpush.msrb.mxu3 %v168_v4 }
  0x30   :  { %245 = vmatpush.msrb.mxu0 %v215_v11 }
  0x32   :  { %246 = vmatpush.msrb.mxu0 %v214_v12 }
  0x34   :  { %247 = vmatpush.msrb.mxu0 %v213_v13 }
  0x36   :  { %248 = vmatpush.msrb.mxu0 %v212_v23 }
  0x38   :  { %249 = vmatpush.msrb.mxu0 %v211_v24 }
  0x92   :  { %v165_v20 = vpop.f32.mrf.mxu3 }
  0x9f   :  { %v105_v15 = vpop.f32.mrf.mxu0 }
  0xa0   :  { %v106_v16 = vadd.f32 %v263_v14, %v105_v15  ;;  %v125_v17 = vpop.f32.mrf.mxu1 }
  0xa2   :  { %v126_v18 = vadd.f32 %v125_v17, %v106_v16 }
  0xa4   :  { %v145_v19 = vpop.f32.mrf.mxu2 }
  0xa5   :  { %v146_v21 = vadd.f32 %v145_v19, %v126_v18 }
  0xa7   :  { %v166_v22 = vadd.f32 %v165_v20, %v146_v21 }
  0xa9   :  { %260 = vmatmul.msk.f32.vlgmr.msrb.gmra.mxu3 %vm187_vm2, %v166_v22 }
 0x12c   :  { %v208_v26 = vpop.f32.mrf.mxu3 }
 0x12d   :  { %v209_v27 = vadd.f32 %v264_v25, %v208_v26 }
 0x12f   :  { %262 = vmatmul.msk.f32.vlgmr.msrb.gmra.mxu0 %vm226_vm3, %v209_v27 }
 0x1ac   :  { %v251_v29 = vpop.f32.mrf.mxu0 }
 0x1ad   :  { %v252_v30 = vadd.f32 %v265_v28, %v251_v29 }
 0x1af   :  { %254 = vst [vmem:[%s565_s7] sm:$0xff] %v252_v30 }

// kernel: lenet_forward.4
= control target key start
LH: loop header
LB: loop body
LE: loop exit
PB: predicated region body
PF: predicated region fallthrough
CT: control target
= control target key end

     0   :  { %s1192_s24 = smov 0   ;;  %s1724_s0 = inlined_call_operand.vmem [shape: f32[2,14,84], index: 0, kind: input, shape index: {}]   ;;  %s1725_s1 = inlined_call_operand.vmem [shape: f32[5,84,160], index: 1, kind: input, shape index: {}]   ;;  %s1726_s2 = inlined_call_operand.vmem [shape: f32[1,160], index: 2, kind: input, shape index: {}]   ;;  %s1727_s3 = inlined_call_operand.vmem [shape: f32[5,10], index: 3, kind: input, shape index: {}]   ;;  %s1728_s4 = inlined_call_operand.vmem [shape: f32[5,10], index: 4, kind: input, shape index: {}]   ;;  %s1729_s5 = inlined_call_operand.vmem [shape: f32[160,80], index: 5, kind: input, shape index: {}]   ;;  %s1730_s6 = inlined_call_operand.vmem [shape: f32[160,80], index: 6, kind: input, shape index: {}]   ;;  %s1731_s7 = inlined_call_operand.vmem [shape: f32[2,5,80], index: 7, kind: output, shape index: {}]  }
   0x1 LB: > { %s997_s25 = sadd.s32 4294967295, %s1150_s24   ;;  %p1001_p0 = scmp.ge.s32.totalorder %s1150_s24, 1  ;;  %s1150_s24 = sphi %s1192_s24, %s17_s24  }
   0x2   : > { %p237_p1 = scmp.lt.s32.totalorder %s1150_s24, 3 }
   0x4   : > { %p238_p2 = pnand %p1001_p0, %p237_p1 }
   0x5   : > { %p1284_p3 = scmp.lt.s32.totalorder (!%p238_p2), %s997_s25, 1 }
   0x6   : > { %241 = sbr.rel (%p238_p2) target bundleno = 506 (0x1fa), region = 48 }
   0xb   : > { %v1025_v0 = vld [vmem:[%s1725_s1 + $0x150] sm:$0xf]  ;;  %vm333_vm0 = vcmask 1043456   ;;  %v1026_v1 = vld [vmem:[%s1725_s1 + $0x158] sm:$0xf]  ;;  %v1023_v2 = vld [vmem:[%s1725_s1 + $0x140] sm:$0xff] }
   0xc   : > { %1027 = vmatpush.msk.msra.mxu0 %vm333_vm0, %v1025_v0  ;;  %1030 = vmatpush.msk.msra.mxu1 %vm333_vm0, %v1026_v1  ;;  %v299_v3 = vld [vmem:[%s1725_s1 + $0xa0] sm:$0xf]  ;;  %v300_v4 = vld [vmem:[%s1725_s1 + $0xa8] sm:$0xf]  ;;  %v297_v6 = vld [vmem:[%s1725_s1 + $0x90] sm:$0xff]  ;;  %s1734_s25 = smov (!%p1284_p3, %s997_s25), 1 }
   0xd   : > { %v1024_v5 = vld [vmem:[%s1725_s1 + $0x148] sm:$0xff]  ;;  %1033 = vmatpush.msk.msra.mxu2 %vm333_vm0, %v299_v3  ;;  %1036 = vmatpush.msk.msra.mxu3 %vm333_vm0, %v300_v4  ;;  %v298_v7 = vld [vmem:[%s1725_s1 + $0x98] sm:$0xff]  ;;  %v1021_v8 = vld [vmem:[%s1725_s1 + $0x130] sm:$0xff]  ;;  %s1135_s27 = sshll.u32 %s1734_s25, 4  ;;  %vm326_vm1 = vcmask 687104   ;;  %vm724_vm2 = vcmask 1041408  }
   0xe   : > { %346 = vmatpush.msra.mxu0 %v1023_v2  ;;  %369 = vmatpush.msra.mxu1 %v1024_v5  ;;  %v1022_v9 = vld [vmem:[%s1725_s1 + $0x138] sm:$0xff]  ;;  %v295_v10 = vld [vmem:[%s1725_s1 + $0x80] sm:$0xff]  ;;  %v296_v11 = vld [vmem:[%s1725_s1 + $0x88] sm:$0xff]  ;;  %s1364_s19 = scalar_lea.vmem %s1724_s0, %s1135_s27  ;;  %vm720_vm3 = vcmask 80896   ;;  %vm837_vm4 = vcmask 261120   ;;  %s1004_s28 = sshll.u32 %s1734_s25, 3 }
   0xf   : > { %404 = vmatpush.msra.mxu2 %v297_v6  ;;  %427 = vmatpush.msra.mxu3 %v298_v7  ;;  %v1019_v12 = vld [vmem:[%s1725_s1 + $0x120] sm:$0xff]  ;;  %v1020_v13 = vld [vmem:[%s1725_s1 + $0x128] sm:$0xff]  ;;  %v293_v14 = vld [vmem:[%s1725_s1 + $0x70] sm:$0xff]  ;;  %s276_s30 = scalar_lea.vmem %s1731_s7, %s1004_s28  ;;  %vm942_vm5 = vcmask 651264  }
  0x10   : > { %347 = vmatpush.msra.mxu0 %v1021_v8  ;;  %370 = vmatpush.msra.mxu1 %v1022_v9  ;;  %v294_v15 = vld [vmem:[%s1725_s1 + $0x78] sm:$0xff]  ;;  %v1017_v16 = vld [vmem:[%s1725_s1 + $0x110] sm:$0xff]  ;;  %v291_v18 = vld [vmem:[%s1725_s1 + $0x60] sm:$0xff] }
  0x11   : > { %405 = vmatpush.msra.mxu2 %v295_v10  ;;  %428 = vmatpush.msra.mxu3 %v296_v11  ;;  %v1018_v17 = vld [vmem:[%s1725_s1 + $0x118] sm:$0xff]  ;;  %v292_v19 = vld [vmem:[%s1725_s1 + $0x68] sm:$0xff]  ;;  %v1015_v20 = vld [vmem:[%s1725_s1 + $0x100] sm:$0xff] }
  0x12   : > { %348 = vmatpush.msra.mxu0 %v1019_v12  ;;  %371 = vmatpush.msra.mxu1 %v1020_v13  ;;  %v1016_v21 = vld [vmem:[%s1725_s1 + $0x108] sm:$0xff]  ;;  %v289_v22 = vld [vmem:[%s1725_s1 + $0x50] sm:$0xff]  ;;  %v290_v23 = vld [vmem:[%s1725_s1 + $0x58] sm:$0xff] }
  0x13   : > { %406 = vmatpush.msra.mxu2 %v293_v14  ;;  %429 = vmatpush.msra.mxu3 %v294_v15  ;;  %v1013_v24 = vld [vmem:[%s1725_s1 + $0xf0] sm:$0xff]  ;;  %v1014_v25 = vld [vmem:[%s1725_s1 + $0xf8] sm:$0xff]  ;;  %v287_v26 = vld [vmem:[%s1725_s1 + $0x40] sm:$0xff] }
  0x14   : > { %349 = vmatpush.msra.mxu0 %v1017_v16  ;;  %372 = vmatpush.msra.mxu1 %v1018_v17  ;;  %v288_v27 = vld [vmem:[%s1725_s1 + $0x48] sm:$0xff]  ;;  %v1011_v28 = vld [vmem:[%s1725_s1 + $0xe0] sm:$0xff]  ;;  %v285_v30 = vld [vmem:[%s1725_s1 + $0x30] sm:$0xff] }
  0x15   : > { %407 = vmatpush.msra.mxu2 %v291_v18  ;;  %430 = vmatpush.msra.mxu3 %v292_v19  ;;  %v1012_v29 = vld [vmem:[%s1725_s1 + $0xe8] sm:$0xff]  ;;  %v286_v31 = vld [vmem:[%s1725_s1 + $0x38] sm:$0xff]  ;;  %v1009_v32 = vld [vmem:[%s1725_s1 + $0xd0] sm:$0xff] }
  0x16   : > { %350 = vmatpush.msra.mxu0 %v1015_v20  ;;  %373 = vmatpush.msra.mxu1 %v1016_v21  ;;  %v1010_v33 = vld [vmem:[%s1725_s1 + $0xd8] sm:$0xff]  ;;  %v283_v34 = vld [vmem:[%s1725_s1 + $0x20] sm:$0xff]  ;;  %v284_v35 = vld [vmem:[%s1725_s1 + $0x28] sm:$0xff] }
  0x17   : > { %408 = vmatpush.msra.mxu2 %v289_v22  ;;  %431 = vmatpush.msra.mxu3 %v290_v23  ;;  %v1007_v36 = vld [vmem:[%s1725_s1 + $0xc0] sm:$0xff]  ;;  %v1008_v37 = vld [vmem:[%s1725_s1 + $0xc8] sm:$0xff]  ;;  %v281_v38 = vld [vmem:[%s1725_s1 + $0x10] sm:$0xff] }
  0x18   : > { %351 = vmatpush.msra.mxu0 %v1013_v24  ;;  %374 = vmatpush.msra.mxu1 %v1014_v25  ;;  %v282_v39 = vld [vmem:[%s1725_s1 + $0x18] sm:$0xff]  ;;  %v1005_v40 = vld [vmem:[%s1725_s1 + $0xb0] sm:$0xff]  ;;  %v279_v42 = vld [vmem:[%s1725_s1] sm:$0xff] }
  0x19   : > { %409 = vmatpush.msra.mxu2 %v287_v26  ;;  %432 = vmatpush.msra.mxu3 %v288_v27  ;;  %v1006_v41 = vld [vmem:[%s1725_s1 + $0xb8] sm:$0xff]  ;;  %v280_v43 = vld [vmem:[%s1725_s1 + $0x8] sm:$0xff]  ;;  %v1059_v44 = vld [vmem:[%s1725_s1 + $0x200] sm:$0xf] }
  0x1a   : > { %352 = vmatpush.msra.mxu0 %v1011_v28  ;;  %375 = vmatpush.msra.mxu1 %v1012_v29  ;;  %v1060_v45 = vld [vmem:[%s1725_s1 + $0x208] sm:$0xf]  ;;  %v1087_v46 = vld [vmem:[%s1725_s1 + $0x2b0] sm:$0xf]  ;;  %v1088_v47 = vld [vmem:[%s1725_s1 + $0x2b8] sm:$0xf] }
  0x1b   : > { %410 = vmatpush.msra.mxu2 %v285_v30  ;;  %433 = vmatpush.msra.mxu3 %v286_v31  ;;  %v1057_v48 = vld [vmem:[%s1725_s1 + $0x1f0] sm:$0xff]  ;;  %v1058_v49 = vld [vmem:[%s1725_s1 + $0x1f8] sm:$0xff]  ;;  %v1085_v50 = vld [vmem:[%s1725_s1 + $0x2a0] sm:$0xff] }
  0x1c   : > { %353 = vmatpush.msra.mxu0 %v1009_v32  ;;  %376 = vmatpush.msra.mxu1 %v1010_v33  ;;  %v1086_v51 = vld [vmem:[%s1725_s1 + $0x2a8] sm:$0xff]  ;;  %v277_v52 = vld [vmem:[%s1364_s19] sm:$0xff]  ;;  %v1083_v55 = vld [vmem:[%s1725_s1 + $0x290] sm:$0xff] }
  0x1d   : > { %411 = vmatpush.msra.mxu2 %v283_v34  ;;  %434 = vmatpush.msra.mxu3 %v284_v35  ;;  %v1055_v53 = vld [vmem:[%s1725_s1 + $0x1e0] sm:$0xff]  ;;  %v1056_v54 = vld [vmem:[%s1725_s1 + $0x1e8] sm:$0xff]  ;;  %v1084_v56 = vld [vmem:[%s1725_s1 + $0x298] sm:$0xff] }
  0x1e   : > { %354 = vmatpush.msra.mxu0 %v1007_v36  ;;  %377 = vmatpush.msra.mxu1 %v1008_v37  ;;  %v301_v57 = vld [vmem:[%s1364_s19 + $0x1] sm:$0xff]  ;;  %v1053_v58 = vld [vmem:[%s1725_s1 + $0x1d0] sm:$0xff]  ;;  %v1054_v59 = vld [vmem:[%s1725_s1 + $0x1d8] sm:$0xff] }
  0x1f   : > { %412 = vmatpush.msra.mxu2 %v281_v38  ;;  %435 = vmatpush.msra.mxu3 %v282_v39  ;;  %v1081_v60 = vld [vmem:[%s1725_s1 + $0x280] sm:$0xff]  ;;  %v1082_v61 = vld [vmem:[%s1725_s1 + $0x288] sm:$0xff]  ;;  %v1079_v0 = vld [vmem:[%s1725_s1 + $0x270] sm:$0xff] }
  0x20   : > { %355 = vmatpush.msra.mxu0 %v1005_v40  ;;  %378 = vmatpush.msra.mxu1 %v1006_v41  ;;  %v1051_v62 = vld [vmem:[%s1725_s1 + $0x1c0] sm:$0xff]  ;;  %v1052_v63 = vld [vmem:[%s1725_s1 + $0x1c8] sm:$0xff]  ;;  %v1080_v1 = vld [vmem:[%s1725_s1 + $0x278] sm:$0xff] }
  0x21   : > { %413 = vmatpush.msra.mxu2 %v279_v42  ;;  %436 = vmatpush.msra.mxu3 %v280_v43  ;;  %v1049_v2 = vld [vmem:[%s1725_s1 + $0x1b0] sm:$0xff]  ;;  %v1050_v3 = vld [vmem:[%s1725_s1 + $0x1b8] sm:$0xff]  ;;  %v1077_v4 = vld [vmem:[%s1725_s1 + $0x260] sm:$0xff] }
  0x22   : > { %1061 = vmatpush.msk.msrb.mxu0 %vm333_vm0, %v1059_v44  ;;  %1064 = vmatpush.msk.msrb.mxu1 %vm333_vm0, %v1060_v45  ;;  %v1078_v5 = vld [vmem:[%s1725_s1 + $0x268] sm:$0xff]  ;;  %v1047_v7 = vld [vmem:[%s1725_s1 + $0x1a0] sm:$0xff]  ;;  %v1075_v9 = vld [vmem:[%s1725_s1 + $0x250] sm:$0xff] }
  0x23   : > { %1089 = vmatpush.msk.msrb.mxu2 %vm333_vm0, %v1087_v46  ;;  %1092 = vmatpush.msk.msrb.mxu3 %vm333_vm0, %v1088_v47  ;;  %v278_v6 = vld [vmem:[%s1364_s19 + $0x8] sm:$0x3]  ;;  %v1076_v10 = vld [vmem:[%s1725_s1 + $0x258] sm:$0xff]  ;;  %v1045_v12 = vld [vmem:[%s1725_s1 + $0x190] sm:$0xff] }
  0x24   : > { %487 = vmatpush.msrb.mxu0 %v1057_v48  ;;  %510 = vmatpush.msrb.mxu1 %v1058_v49  ;;  %v1048_v8 = vld [vmem:[%s1725_s1 + $0x1a8] sm:$0xff]  ;;  %v1046_v13 = vld [vmem:[%s1725_s1 + $0x198] sm:$0xff]  ;;  %v1073_v14 = vld [vmem:[%s1725_s1 + $0x240] sm:$0xff] }
  0x25   : > { %574 = vmatpush.msrb.mxu2 %v1085_v50  ;;  %597 = vmatpush.msrb.mxu3 %v1086_v51  ;;  %v302_v11 = vld [vmem:[%s1364_s19 + $0x9] sm:$0x3]  ;;  %v1043_v16 = vld [vmem:[%s1725_s1 + $0x180] sm:$0xff]  ;;  %v1071_v18 = vld [vmem:[%s1725_s1 + $0x230] sm:$0xff] }
  0x26   : > { %1037 = vmatmul.msk.f32.vlgmr.msra.gmra.mxu3 %vm326_vm1, %v277_v52  ;;  %488 = vmatpush.msrb.mxu0 %v1055_v53  ;;  %v1074_v15 = vld [vmem:[%s1725_s1 + $0x248] sm:$0xff]  ;;  %v1072_v19 = vld [vmem:[%s1725_s1 + $0x238] sm:$0xff]  ;;  %v1041_v20 = vld [vmem:[%s1725_s1 + $0x170] sm:$0xff] }
  0x27   : > { %511 = vmatpush.msrb.mxu1 %v1056_v54  ;;  %575 = vmatpush.msrb.mxu2 %v1083_v55  ;;  %v1044_v17 = vld [vmem:[%s1725_s1 + $0x188] sm:$0xff]  ;;  %v1042_v21 = vld [vmem:[%s1725_s1 + $0x178] sm:$0xff]  ;;  %v1069_v22 = vld [vmem:[%s1725_s1 + $0x220] sm:$0xff] }
  0x28   : > { %598 = vmatpush.msrb.mxu3 %v1084_v56  ;;  %1028 = vmatmul.msk.f32.vlgmr.msra.gmra.mxu0 %vm326_vm1, %v301_v57  ;;  %v1070_v23 = vld [vmem:[%s1725_s1 + $0x228] sm:$0xff]  ;;  %v1039_v24 = vld [vmem:[%s1725_s1 + $0x160] sm:$0xff]  ;;  %v1067_v26 = vld [vmem:[%s1725_s1 + $0x210] sm:$0xff] }
  0x29   : > { %1031 = vmatmul.msk.f32.vlgmr.msra.gmra.mxu1 %vm326_vm1, %v301_v57  ;;  %1034 = vmatmul.msk.f32.vlgmr.msra.gmra.mxu2 %vm326_vm1, %v277_v52  ;;  %v1040_v25 = vld [vmem:[%s1725_s1 + $0x168] sm:$0xff]  ;;  %v1068_v27 = vld [vmem:[%s1725_s1 + $0x218] sm:$0xff]  ;;  %v1115_v30 = vld [vmem:[%s1725_s1 + $0x360] sm:$0xf] }
  0x2a   : > { %489 = vmatpush.msrb.mxu0 %v1053_v58  ;;  %512 = vmatpush.msrb.mxu1 %v1054_v59  ;;  %v444_v28 = vld [vmem:[%s1364_s19 + $0x2] sm:$0xff]  ;;  %v1113_v32 = vld [vmem:[%s1725_s1 + $0x350] sm:$0xff]  ;;  %v1114_v33 = vld [vmem:[%s1725_s1 + $0x358] sm:$0xff] }
  0x2b   : > { %576 = vmatpush.msrb.mxu2 %v1081_v60  ;;  %599 = vmatpush.msrb.mxu3 %v1082_v61  ;;  %v531_v29 = vld [vmem:[%s1364_s19 + $0x3] sm:$0xff]  ;;  %v1109_v36 = vld [vmem:[%s1725_s1 + $0x330] sm:$0xff]  ;;  %v1110_v37 = vld [vmem:[%s1725_s1 + $0x338] sm:$0xff] }
  0x2c   : > { %490 = vmatpush.msrb.mxu0 %v1051_v62  ;;  %513 = vmatpush.msrb.mxu1 %v1052_v63  ;;  %v1116_v31 = vld [vmem:[%s1725_s1 + $0x368] sm:$0xf]  ;;  %v1111_v34 = vld [vmem:[%s1725_s1 + $0x340] sm:$0xff]  ;;  %v1105_v42 = vld [vmem:[%s1725_s1 + $0x310] sm:$0xff] }
  0x2d   : > { %577 = vmatpush.msrb.mxu2 %v1079_v0  ;;  %600 = vmatpush.msrb.mxu3 %v1080_v1  ;;  %v1112_v35 = vld [vmem:[%s1725_s1 + $0x348] sm:$0xff]  ;;  %v1107_v40 = vld [vmem:[%s1725_s1 + $0x320] sm:$0xff]  ;;  %v1106_v43 = vld [vmem:[%s1725_s1 + $0x318] sm:$0xff] }
  0x2e   : > { %491 = vmatpush.msrb.mxu0 %v1049_v2  ;;  %514 = vmatpush.msrb.mxu1 %v1050_v3  ;;  %v445_v38 = vld [vmem:[%s1364_s19 + $0xa] sm:$0x3]  ;;  %v1103_v44 = vld [vmem:[%s1725_s1 + $0x300] sm:$0xff]  ;;  %v1101_v46 = vld [vmem:[%s1725_s1 + $0x2f0] sm:$0xff] }
  0x2f   : > { %578 = vmatpush.msrb.mxu2 %v1077_v4  ;;  %601 = vmatpush.msrb.mxu3 %v1078_v5  ;;  %v532_v39 = vld [vmem:[%s1364_s19 + $0xb] sm:$0x3]  ;;  %v1102_v47 = vld [vmem:[%s1725_s1 + $0x2f8] sm:$0xff]  ;;  %v1099_v48 = vld [vmem:[%s1725_s1 + $0x2e0] sm:$0xff] }
  0x30   : > { %1038 = vmatmul.msk.f32.gmra.mxu3 %vm326_vm1, %v278_v6  ;;  %492 = vmatpush.msrb.mxu0 %v1047_v7  ;;  %v1108_v41 = vld [vmem:[%s1725_s1 + $0x328] sm:$0xff]  ;;  %v1097_v50 = vld [vmem:[%s1725_s1 + $0x2d0] sm:$0xff]  ;;  %v1098_v51 = vld [vmem:[%s1725_s1 + $0x2d8] sm:$0xff] }
  0x31   : > { %515 = vmatpush.msrb.mxu1 %v1048_v8  ;;  %579 = vmatpush.msrb.mxu2 %v1075_v9  ;;  %v1104_v45 = vld [vmem:[%s1725_s1 + $0x308] sm:$0xff]  ;;  %v1095_v52 = vld [vmem:[%s1725_s1 + $0x2c0] sm:$0xff]  ;;  %v896_v7 = vld [vmem:[%s1730_s6 + $0x78] sm:$0xff] }
  0x32   : > { %602 = vmatpush.msrb.mxu3 %v1076_v10  ;;  %1029 = vmatmul.msk.f32.gmra.mxu0 %vm326_vm1, %v302_v11  ;;  %v1100_v49 = vld [vmem:[%s1725_s1 + $0x2e8] sm:$0xff]  ;;  %v831_v8 = vld [vmem:[%s1729_s5 + $0x70] sm:$0xff] }
  0x33   : > { %1032 = vmatmul.msk.f32.gmra.mxu1 %vm326_vm1, %v302_v11  ;;  %1035 = vmatmul.msk.f32.gmra.mxu2 %vm326_vm1, %v278_v6  ;;  %v1096_v53 = vld [vmem:[%s1725_s1 + $0x2c8] sm:$0xff]  ;;  %v832_v6 = vld [vmem:[%s1729_s5 + $0x78] sm:$0xff]  ;;  %v895_v9 = vld [vmem:[%s1730_s6 + $0x70] sm:$0xff] }
  0x34   : > { %493 = vmatpush.msrb.mxu0 %v1045_v12  ;;  %516 = vmatpush.msrb.mxu1 %v1046_v13  ;;  %v618_v54 = vld [vmem:[%s1364_s19 + $0x4] sm:$0xff]  ;;  %v619_v55 = vld [vmem:[%s1364_s19 + $0xc] sm:$0x3] }
  0x35   : > { %580 = vmatpush.msrb.mxu2 %v1073_v14  ;;  %603 = vmatpush.msrb.mxu3 %v1074_v15  ;;  %v830_v10 = vld [vmem:[%s1729_s5 + $0x68] sm:$0xff]  ;;  %v829_v12 = vld [vmem:[%s1729_s5 + $0x60] sm:$0xff] }
  0x36   : > { %494 = vmatpush.msrb.mxu0 %v1043_v16  ;;  %517 = vmatpush.msrb.mxu1 %v1044_v17  ;;  %v894_v11 = vld [vmem:[%s1730_s6 + $0x68] sm:$0xff]  ;;  %v893_v13 = vld [vmem:[%s1730_s6 + $0x60] sm:$0xff] }
  0x37   : > { %581 = vmatpush.msrb.mxu2 %v1071_v18  ;;  %604 = vmatpush.msrb.mxu3 %v1072_v19  ;;  %v828_v18 = vld [vmem:[%s1729_s5 + $0x58] sm:$0xff] }
  0x38   : > { %495 = vmatpush.msrb.mxu0 %v1041_v20  ;;  %518 = vmatpush.msrb.mxu1 %v1042_v21  ;;  %v892_v19 = vld [vmem:[%s1730_s6 + $0x58] sm:$0xff] }
  0x39   : > { %582 = vmatpush.msrb.mxu2 %v1069_v22  ;;  %605 = vmatpush.msrb.mxu3 %v1070_v23 }
  0x3a   : > { %496 = vmatpush.msrb.mxu0 %v1039_v24  ;;  %519 = vmatpush.msrb.mxu1 %v1040_v25  ;;  %v705_v24 = vld [vmem:[%s1726_s2] sm:$0x3]  ;;  %v827_v25 = vld [vmem:[%s1729_s5 + $0x50] sm:$0xff] }
  0x3b   : > { %583 = vmatpush.msrb.mxu2 %v1067_v26  ;;  %606 = vmatpush.msrb.mxu3 %v1068_v27  ;;  %v891_v26 = vld [vmem:[%s1730_s6 + $0x50] sm:$0xff] }
  0x3c   : > { %1062 = vmatmul.msk.f32.vlgmr.msrb.gmra.mxu0 %vm326_vm1, %v444_v28  ;;  %1065 = vmatmul.msk.f32.vlgmr.msrb.gmra.mxu1 %vm326_vm1, %v444_v28 }
  0x3d   : > { %1090 = vmatmul.msk.f32.vlgmr.msrb.gmra.mxu2 %vm326_vm1, %v531_v29  ;;  %1093 = vmatmul.msk.f32.vlgmr.msrb.gmra.mxu3 %vm326_vm1, %v531_v29 }
  0x3e   : > { %1117 = vmatpush.msk.msra.mxu0 %vm333_vm0, %v1115_v30  ;;  %1120 = vmatpush.msk.msra.mxu1 %vm333_vm0, %v1116_v31 }
  0x40   : > { %661 = vmatpush.msra.mxu0 %v1113_v32  ;;  %684 = vmatpush.msra.mxu1 %v1114_v33  ;;  %v826_v33 = vld [vmem:[%s1729_s5 + $0x48] sm:$0xff] }
  0x42   : > { %662 = vmatpush.msra.mxu0 %v1111_v34  ;;  %685 = vmatpush.msra.mxu1 %v1112_v35  ;;  %v890_v34 = vld [vmem:[%s1730_s6 + $0x48] sm:$0xff]  ;;  %v707_v35 = vperm.slane %v705_v24, 0 }
  0x44   : > { %663 = vmatpush.msra.mxu0 %v1109_v36  ;;  %686 = vmatpush.msra.mxu1 %v1110_v37  ;;  %v708_v36 = vperm.slane %v705_v24, 1 }
  0x45   : > { %1063 = vmatmul.msk.f32.gmra.mxu0 %vm326_vm1, %v445_v38  ;;  %1066 = vmatmul.msk.f32.gmra.mxu1 %vm326_vm1, %v445_v38 }
  0x46   : > { %1091 = vmatmul.msk.f32.gmra.mxu2 %vm326_vm1, %v532_v39  ;;  %1094 = vmatmul.msk.f32.gmra.mxu3 %vm326_vm1, %v532_v39 }
  0x47   : > { %664 = vmatpush.msra.mxu0 %v1107_v40  ;;  %687 = vmatpush.msra.mxu1 %v1108_v41 }
  0x49   : > { %665 = vmatpush.msra.mxu0 %v1105_v42  ;;  %688 = vmatpush.msra.mxu1 %v1106_v43 }
  0x4b   : > { %666 = vmatpush.msra.mxu0 %v1103_v44  ;;  %689 = vmatpush.msra.mxu1 %v1104_v45 }
  0x4d   : > { %667 = vmatpush.msra.mxu0 %v1101_v46  ;;  %690 = vmatpush.msra.mxu1 %v1102_v47 }
  0x4f   : > { %668 = vmatpush.msra.mxu0 %v1099_v48  ;;  %691 = vmatpush.msra.mxu1 %v1100_v49 }
  0x51   : > { %669 = vmatpush.msra.mxu0 %v1097_v50  ;;  %692 = vmatpush.msra.mxu1 %v1098_v51 }
  0x53   : > { %670 = vmatpush.msra.mxu0 %v1095_v52  ;;  %693 = vmatpush.msra.mxu1 %v1096_v53  ;;  %v719_v53 = vld [vmem:[%s1727_s3] sm:$0x1f] }
  0x54   : > { %1118 = vmatmul.msk.f32.vlgmr.msra.gmra.mxu0 %vm326_vm1, %v618_v54  ;;  %1121 = vmatmul.msk.f32.vlgmr.msra.gmra.mxu1 %vm326_vm1, %v618_v54  ;;  %v771_v54 = vld [vmem:[%s1728_s4] sm:$0x1f] }
  0x55   : > { %841 = vmatpush.msrb.mxu0 %v832_v6  ;;  %901 = vmatpush.msrb.mxu1 %v896_v7  ;;  %v884_v6 = vld [vmem:[%s1730_s6 + $0x18] sm:$0xff]  ;;  %v819_v7 = vld [vmem:[%s1729_s5 + $0x10] sm:$0xff] }
  0x57   : > { %842 = vmatpush.msrb.mxu0 %v831_v8  ;;  %902 = vmatpush.msrb.mxu1 %v895_v9  ;;  %v883_v8 = vld [vmem:[%s1730_s6 + $0x10] sm:$0xff]  ;;  %v834_v9 = vld [vmem:[%s1729_s5 + $0x88] sm:$0xff] }
  0x59   : > { %843 = vmatpush.msrb.mxu0 %v830_v10  ;;  %903 = vmatpush.msrb.mxu1 %v894_v11  ;;  %v898_v10 = vld [vmem:[%s1730_s6 + $0x88] sm:$0xff] }
  0x5a   : > { %v818_v11 = vld [vmem:[%s1729_s5 + $0x8] sm:$0xff] }
  0x5b   : > { %844 = vmatpush.msrb.mxu0 %v829_v12  ;;  %904 = vmatpush.msrb.mxu1 %v893_v13  ;;  %v882_v12 = vld [vmem:[%s1730_s6 + $0x8] sm:$0xff]  ;;  %v833_v13 = vld [vmem:[%s1729_s5 + $0x80] sm:$0xff] }
  0x5c   : > { %1119 = vmatmul.msk.f32.gmra.mxu0 %vm326_vm1, %v619_v55  ;;  %1122 = vmatmul.msk.f32.gmra.mxu1 %vm326_vm1, %v619_v55  ;;  %v825_v55 = vld [vmem:[%s1729_s5 + $0x40] sm:$0xff] }
  0x5d   : > { %845 = vmatpush.msrb.mxu0 %v828_v18  ;;  %905 = vmatpush.msrb.mxu1 %v892_v19 }
  0x5f   : > { %846 = vmatpush.msrb.mxu0 %v827_v25  ;;  %906 = vmatpush.msrb.mxu1 %v891_v26 }
  0x61   : > { %847 = vmatpush.msrb.mxu0 %v826_v33  ;;  %907 = vmatpush.msrb.mxu1 %v890_v34 }
  0x63   : > { %848 = vmatpush.msrb.mxu0 %v825_v55 }
  0xa5   : > { %v357_v56 = vpop.f32.mrf.mxu0 }
  0xa6   : > { %v380_v57 = vpop.f32.mrf.mxu1 }
  0xa9   : > { %v438_v60 = vpop.f32.mrf.mxu3 }
  0xaa   : > { %v439_v16 = vadd.f32 %v438_v60, %v380_v57  ;;  %v824_v57 = vld [vmem:[%s1729_s5 + $0x38] sm:$0xff]  ;;  %v887_v60 = vld [vmem:[%s1730_s6 + $0x30] sm:$0xff] }
  0xab   : > { %849 = vmatpush.msrb.mxu0 %v824_v57 }
  0xac   : > { %v415_v61 = vpop.f32.mrf.mxu2 }
  0xad   : > { %v416_v17 = vadd.f32 %v415_v61, %v357_v56  ;;  %v889_v56 = vld [vmem:[%s1730_s6 + $0x40] sm:$0xff]  ;;  %v822_v61 = vld [vmem:[%s1729_s5 + $0x28] sm:$0xff] }
  0xae   : > { %908 = vmatpush.msrb.mxu1 %v889_v56 }
  0xaf   : > { %v360_v58 = vpop.f32.mrf.mxu0 }
  0xb0   : > { %v383_v59 = vpop.f32.mrf.mxu1 }
  0xb3   : > { %v441_v0 = vpop.f32.mrf.mxu3 }
  0xb4   : > { %v442_v20 = vadd.f32 %v441_v0, %v383_v59  ;;  %v823_v59 = vld [vmem:[%s1729_s5 + $0x30] sm:$0xff]  ;;  %v900_v0 = vld [vmem:[%s1730_s6 + $0x98] sm:$0xff] }
  0xb5   : > { %850 = vmatpush.msrb.mxu0 %v823_v59 }
  0xb6   : > { %v418_v1 = vpop.f32.mrf.mxu2 }
  0xb7   : > { %v419_v21 = vadd.f32 %v418_v1, %v360_v58  ;;  %v888_v58 = vld [vmem:[%s1730_s6 + $0x38] sm:$0xff]  ;;  %851 = vmatpush.msrb.mxu0 %v822_v61  ;;  %v835_v1 = vld [vmem:[%s1729_s5 + $0x90] sm:$0xff] }
  0xb8   : > { %909 = vmatpush.msrb.mxu1 %v888_v58 }
  0xb9   : > { %v498_v62 = vpop.f32.mrf.mxu0  ;;  %v521_v63 = vpop.f32.mrf.mxu1 }
  0xba   : > { %v527_v22 = vadd.f32 %v498_v62, %v416_v17  ;;  %v528_v23 = vadd.f32 %v521_v63, %v439_v16  ;;  %910 = vmatpush.msrb.mxu1 %v887_v60  ;;  %v886_v62 = vld [vmem:[%s1730_s6 + $0x28] sm:$0xff]  ;;  %v836_v63 = vld [vmem:[%s1729_s5 + $0x98] sm:$0xff]  ;;  %v881_v16 = vld [vmem:[%s1730_s6] sm:$0xff] }
  0xbc   : > { %911 = vmatpush.msrb.mxu1 %v886_v62 }
  0xc0   : > { %v585_v4 = vpop.f32.mrf.mxu2  ;;  %v608_v5 = vpop.f32.mrf.mxu3 }
  0xc1   : > { %v614_v29 = vadd.f32 %v585_v4, %v527_v22  ;;  %v615_v30 = vadd.f32 %v608_v5, %v528_v23  ;;  %v885_v4 = vld [vmem:[%s1730_s6 + $0x20] sm:$0xff]  ;;  %v820_v5 = vld [vmem:[%s1729_s5 + $0x18] sm:$0xff] }
  0xc2   : > { %v501_v2 = vpop.f32.mrf.mxu0  ;;  %v524_v3 = vpop.f32.mrf.mxu1  ;;  %912 = vmatpush.msrb.mxu1 %v885_v4 }
  0xc3   : > { %v529_v31 = vadd.f32 %v501_v2, %v419_v21  ;;  %v530_v32 = vadd.f32 %v524_v3, %v442_v20  ;;  %v899_v2 = vld [vmem:[%s1730_s6 + $0x90] sm:$0xff]  ;;  %v821_v3 = vld [vmem:[%s1729_s5 + $0x20] sm:$0xff] }
  0xc4   : > { %852 = vmatpush.msrb.mxu0 %v821_v3  ;;  %913 = vmatpush.msrb.mxu1 %v884_v6 }
  0xc6   : > { %853 = vmatpush.msrb.mxu0 %v820_v5  ;;  %914 = vmatpush.msrb.mxu1 %v883_v8 }
  0xc8   : > { %854 = vmatpush.msrb.mxu0 %v819_v7  ;;  %915 = vmatpush.msrb.mxu1 %v882_v12 }
  0xc9   : > { %v588_v27 = vpop.f32.mrf.mxu2  ;;  %v611_v28 = vpop.f32.mrf.mxu3 }
  0xca   : > { %v616_v37 = vadd.f32 %v588_v27, %v529_v31  ;;  %v617_v38 = vadd.f32 %v611_v28, %v530_v32  ;;  %855 = vmatpush.msrb.mxu0 %v818_v11  ;;  %916 = vmatpush.msrb.mxu1 %v881_v16 }
  0xd1   : > { %v672_v14 = vpop.f32.mrf.mxu0  ;;  %v695_v15 = vpop.f32.mrf.mxu1 }
  0xd2   : > { %v701_v39 = vadd.f32 %v672_v14, %v614_v29  ;;  %v702_v40 = vadd.f32 %v695_v15, %v615_v30  ;;  %v897_v14 = vld [vmem:[%s1730_s6 + $0x80] sm:$0xff] }
  0xd3   : > { %v817_v15 = vld [vmem:[%s1729_s5] sm:$0xff] }
  0xd4   : > { %v711_v45 = vadd.f32 %v707_v35, %v701_v39  ;;  %v712_v46 = vadd.f32 %v708_v36, %v702_v40  ;;  %856 = vmatpush.msrb.mxu0 %v817_v15 }
  0xd6   : > { %v715_v51 = vmax.f32 %v711_v45, 0.0  ;;  %v716_v52 = vmax.f32 %v712_v46, 0.0 }
  0xd9   : > { %v675_v41 = vpop.f32.mrf.mxu0  ;;  %v698_v42 = vpop.f32.mrf.mxu1 }
  0xda   : > { %v703_v43 = vadd.f32 %v675_v41, %v616_v37  ;;  %v704_v44 = vadd.f32 %v698_v42, %v617_v38 }
  0xdc   : > { %v713_v47 = vadd.f32 %v707_v35, %v703_v43  ;;  %v714_v48 = vadd.f32 %v708_v36, %v704_v44 }
  0xde   : > { %v717_v49 = vmax.f32 %v713_v47, 0.0  ;;  %v718_v50 = vmax.f32 %v714_v48, 0.0 }
  0xe0   : > { %1123 = vmatpush.msk.msra.mxu2 %vm724_vm2, %v717_v49  ;;  %1125 = vmatpush.msk.msra.mxu3 %vm724_vm2, %v718_v50 }
  0xe2   : > { %746 = vmatpush.msra.mxu2 %v715_v51  ;;  %766 = vmatpush.msra.mxu3 %v716_v52 }
  0xe3   : > { %1126 = vmatmul.msk.f32.vlgmr.msra.gmra.mxu3 %vm720_vm3, %v719_v53  ;;  %1124 = vmatmul.msk.f32.vlgmr.msra.gmra.mxu2 %vm720_vm3, %v719_v53 }
  0xe4   : > { %1127 = vmatpush.msk.msrb.mxu2 %vm724_vm2, %v717_v49  ;;  %1129 = vmatpush.msk.msrb.mxu3 %vm724_vm2, %v718_v50 }
  0xe6   : > { %790 = vmatpush.msrb.mxu2 %v715_v51  ;;  %810 = vmatpush.msrb.mxu3 %v716_v52 }
  0xe8   : > { %873 = vmatpush.msra.mxu2 %v836_v63  ;;  %933 = vmatpush.msra.mxu3 %v900_v0 }
  0xea   : > { %874 = vmatpush.msra.mxu2 %v835_v1  ;;  %934 = vmatpush.msra.mxu3 %v899_v2 }
  0xeb   : > { %1130 = vmatmul.msk.f32.vlgmr.msrb.gmra.mxu3 %vm720_vm3, %v771_v54  ;;  %1128 = vmatmul.msk.f32.vlgmr.msrb.gmra.mxu2 %vm720_vm3, %v771_v54 }
  0xec   : > { %875 = vmatpush.msra.mxu2 %v834_v9  ;;  %935 = vmatpush.msra.mxu3 %v898_v10 }
  0xee   : > { %876 = vmatpush.msra.mxu2 %v833_v13  ;;  %936 = vmatpush.msra.mxu3 %v897_v14 }
 0x166   : > { %v768_v17 = vpop.f32.mrf.mxu3  ;;  %v748_v18 = vpop.f32.mrf.mxu2 }
 0x16e   : > { %v812_v19 = vpop.f32.mrf.mxu3  ;;  %v792_v20 = vpop.f32.mrf.mxu2 }
 0x16f   : > { %v816_v21 = vmax.f32 %v768_v17, %v812_v19  ;;  %v815_v22 = vmax.f32 %v748_v18, %v792_v20 }
 0x171   : > { %1131 = vmatmul.msk.f32.vlgmr.msra.gmra.mxu2 %vm837_vm4, %v816_v21  ;;  %1132 = vmatmul.msk.f32.vlgmr.msra.gmra.mxu3 %vm837_vm4, %v816_v21 }
 0x172   : > { %857 = vmatmul.f32.vlgmr.msrb.gmra.mxu0 %v815_v22  ;;  %917 = vmatmul.f32.vlgmr.msrb.gmra.mxu1 %v815_v22 }
 0x1ef   : > { %v858_v23 = vpop.f32.mrf.mxu0  ;;  %v918_v24 = vpop.f32.mrf.mxu1 }
 0x1f4   : > { %v878_v25 = vpop.f32.mrf.mxu2  ;;  %v938_v26 = vpop.f32.mrf.mxu3 }
 0x1f5   : > { %v879_v27 = vadd.f32 %v878_v25, %v858_v23  ;;  %v939_v28 = vadd.f32 %v938_v26, %v918_v24 }
 0x1f7   : > { %v941_v29 = vmax.f32 %v879_v27, %v939_v28 }
 0x1f9   : > { %943 = vst.msk [vmem:[%s276_s30] sm:$0x1f] %vm942_vm5, %v941_v29 }
 0x1fa PF: > { %s17_s24 = sadd.s32 1, %s1150_s24  }
 0x1fb   : > { %p14_p4 = scmp.ge.s32.totalorder %s17_s24, 4  }
 0x1fd   :  { %16 = sbr.rel (!%p14_p4) target bundleno = 1 (0x1), region = 82 }

</bundles_post_ra>
